<compile_context>
chip_gen: v7x
topology: tpu7x:2x2x1
jax: 0.10.0
libtpu: 0.0.40
codegen_flags: <defaults>
</compile_context>

<pallas_src>
import functools

import jax
import jax.numpy as jnp
from jax import lax
from jax.experimental import pallas as pl
from jax.experimental.pallas import tpu as pltpu


# ---------------------------------------------------------------------------
# Fused kernel: conv1+bn1+relu -> conv2+bn2 -> SE -> +residual -> relu
# Works on one image per grid step in channel-major (C, H*W) layout.
# ---------------------------------------------------------------------------
def _se_basic_block_kernel(mask_ref, x_ref, w1_ref, b1_ref, w2_ref, b2_ref,
                           wfc1_ref, wfc2_ref, o_ref, patch_ref, *, H, W, C):
    HW = H * W

    def conv3x3_bn(src):
        # src: (C, HW) f32.  3x3 conv, stride 1, zero pad 1; BN scale is folded
        # into w_ref so only the bias add remains.
        #
        # im2col directly in the transposed (9C, HW) layout: each of the nine
        # taps is a circular lane-roll of the flat image (XLU slot, ~free)
        # multiplied by a precomputed border mask (zero-padding semantics),
        # then cast to bf16 on the patch store.
        for dh in (-1, 0, 1):
            for dw in (-1, 0, 1):
                t = (dh + 1) * 3 + (dw + 1)
                off = dh * W + dw                    # flat source offset
                tap = src if off == 0 else pltpu.roll(src, shift=(-off) % HW, axis=1)
                if off != 0:
                    # (1, HW) f32 {0,1} mask zeroes row/column-wrap pixels.
                    tap = tap * mask_ref[t:t + 1, :]
                patch_ref[t * C:(t + 1) * C, :] = tap.astype(jnp.bfloat16)
        # single MXU matmul: (C, 9C) @ (9C, HW) -> (C, HW), f32 accumulate;
        # N = HW = 256 keeps the MXU columns fully occupied.
        y = jnp.dot(w_ref_cur[0][...], patch_ref[...],
                    preferred_element_type=jnp.float32)
        return y + w_ref_cur[1][...]                 # folded-BN bias, (C, 1)

    x = x_ref[0]                                     # (C, HW) f32 (also residual)

    # ----- stage 1: conv1 + bn1 + relu (never leaves VMEM) -----
    w_ref_cur = (w1_ref, b1_ref)
    y1 = jnp.maximum(conv3x3_bn(x), 0.0)             # (C, HW) f32

    # ----- stage 2: conv2 + bn2 -----
    w_ref_cur = (w2_ref, b2_ref)
    y2 = conv3x3_bn(y1)                              # (C, HW) f32

    # ----- SE: avgpool -> fc1 -> relu -> fc2 -> sigmoid -> channel rescale -----
    # M=1 matmuls done as broadcast-multiply + lane/sublane reductions
    # (VPU/XLU), keeping them off the MXU.  All in f32.
    pooled = jnp.mean(y2, axis=1, keepdims=True)                       # (C, 1)
    h = jnp.sum(wfc1_ref[...] * pooled, axis=0, keepdims=True)         # (1, Cr)
    h = jnp.maximum(h, 0.0)
    s = jax.nn.sigmoid(jnp.sum(wfc2_ref[...] * h, axis=1, keepdims=True))  # (C, 1)

    # ----- residual + final relu; lane-dense (C, 256) store -----
    out = jnp.maximum(y2 * s + x_ref[0], 0.0)
    o_ref[...] = out.reshape(1, C, HW)


# ---------------------------------------------------------------------------
# Wrapper (PyTorch-style NCHW interface; no transposes, only free reshapes)
# ---------------------------------------------------------------------------
def se_basic_block(x_nchw, params):
    """x_nchw: (B, C, H, W) float32.  Returns (B, C, H, W) float32."""
    B, C, H, W = x_nchw.shape
    HW = H * W
    Cr = params["fc1_w"].shape[0]

    # Fold BN (eval-mode) scale into the conv weights, torch OIHW -> (C, 9C)
    # with column order (kh*3+kw)*C + cin to match the kernel's patch layout.
    def fold(w, gamma, beta, mean, var, eps=1e-5):
        scale = gamma * lax.rsqrt(var + eps)
        bias = beta - mean * scale
        wk = (w * scale[:, None, None, None]).transpose(0, 2, 3, 1)   # (Co,3,3,Ci)
        wk = wk.reshape(C, 9 * C).astype(jnp.bfloat16)
        return wk, bias.reshape(C, 1).astype(jnp.float32)

    w1k, b1k = fold(params["w1"], params["bn1_gamma"], params["bn1_beta"],
                    params["bn1_mean"], params["bn1_var"])
    w2k, b2k = fold(params["w2"], params["bn2_gamma"], params["bn2_beta"],
                    params["bn2_mean"], params["bn2_var"])

    wfc1_t = params["fc1_w"].T          # (C, Cr): torch fc1 weight transposed
    wfc2 = params["fc2_w"]              # (C, Cr): torch fc2 weight as-is

    # Border masks for the 9 taps of a 3x3 / pad=1 conv over the flattened
    # (H*W,) pixel axis (implements zero padding for the rolled taps).
    hh = jnp.repeat(jnp.arange(H), W)   # h index of each flat pixel
    ww = jnp.tile(jnp.arange(W), H)     # w index of each flat pixel
    masks = []
    for dh in (-1, 0, 1):
        for dw in (-1, 0, 1):
            valid = ((hh + dh >= 0) & (hh + dh < H) &
                     (ww + dw >= 0) & (ww + dw < W))
            masks.append(valid.astype(jnp.float32))
    masks = jnp.stack(masks)            # (9, HW)

    x = x_nchw.reshape(B, C, HW)        # free reshape (NCHW flattened)

    out = pl.pallas_call(
        functools.partial(_se_basic_block_kernel, H=H, W=W, C=C),
        out_shape=jax.ShapeDtypeStruct((B, C, HW), jnp.float32),
        grid=(B,),
        in_specs=[
            pl.BlockSpec((9, HW), lambda b: (0, 0)),          # border masks
            pl.BlockSpec((1, C, HW), lambda b: (b, 0, 0)),    # x (also residual)
            pl.BlockSpec((C, 9 * C), lambda b: (0, 0)),       # w1 (BN folded, bf16)
            pl.BlockSpec((C, 1), lambda b: (0, 0)),           # bias1
            pl.BlockSpec((C, 9 * C), lambda b: (0, 0)),       # w2 (BN folded, bf16)
            pl.BlockSpec((C, 1), lambda b: (0, 0)),           # bias2
            pl.BlockSpec((C, Cr), lambda b: (0, 0)),          # SE fc1^T (C, Cr)
            pl.BlockSpec((C, Cr), lambda b: (0, 0)),          # SE fc2   (C, Cr)
        ],
        out_specs=pl.BlockSpec((1, C, HW), lambda b: (b, 0, 0)),
        scratch_shapes=[
            pltpu.VMEM((9 * C, HW), jnp.bfloat16),            # im2col patch (bf16)
        ],
        compiler_params=pltpu.CompilerParams(
            dimension_semantics=("parallel",)),
    )(masks, x, w1k, b1k, w2k, b2k, wfc1_t, wfc2)

    return out.reshape(B, C, H, W)      # free reshape


# ---------------------------------------------------------------------------
# Pure-JAX reference (f32, torch semantics, NCHW) for correctness check
# ---------------------------------------------------------------------------
def se_basic_block_ref(x, params, eps=1e-5):
    def conv(a, w):
        return lax.conv_general_dilated(
            a, w, window_strides=(1, 1), padding="SAME",
            dimension_numbers=("NCHW", "OIHW", "NCHW"))

    def bn(a, g, b, m, v):
        g, b, m, v = (t[None, :, None, None] for t in (g, b, m, v))
        return (a - m) * (g / jnp.sqrt(v + eps)) + b

    out = conv(x, params["w1"])
    out = jnp.maximum(bn(out, params["bn1_gamma"], params["bn1_beta"],
                         params["bn1_mean"], params["bn1_var"]), 0.0)
    out = conv(out, params["w2"])
    out = bn(out, params["bn2_gamma"], params["bn2_beta"],
             params["bn2_mean"], params["bn2_var"])
    pooled = out.mean(axis=(2, 3))                               # (B, C)
    s = jnp.maximum(pooled @ params["fc1_w"].T, 0.0)             # (B, Cr)
    s = jax.nn.sigmoid(s @ params["fc2_w"].T)                    # (B, C)
    out = out * s[:, :, None, None]
    return jnp.maximum(out + x, 0.0)


# ---------------------------------------------------------------------------
# Parameter construction (deterministic, torch-native layouts)
# ---------------------------------------------------------------------------
def make_params(key, C, reduction):
    Cr = C // reduction
    ks = jax.random.split(key, 12)

    def n(k, shape, s=0.1):
        return jax.random.normal(k, shape, jnp.float32) * s

    return {
        "w1": n(ks[0], (C, C, 3, 3)),                 # conv1 OIHW
        "w2": n(ks[1], (C, C, 3, 3)),                 # conv2 OIHW
        "bn1_gamma": 1.0 + n(ks[2], (C,)),
        "bn1_beta": n(ks[3], (C,)),
        "bn1_mean": n(ks[4], (C,)),
        "bn1_var": 0.5 + jnp.abs(n(ks[5], (C,))),
        "bn2_gamma": 1.0 + n(ks[6], (C,)),
        "bn2_beta": n(ks[7], (C,)),
        "bn2_mean": n(ks[8], (C,)),
        "bn2_var": 0.5 + jnp.abs(n(ks[9], (C,))),
        "fc1_w": n(ks[10], (Cr, C), 0.2),             # torch Linear(C -> Cr)
        "fc2_w": n(ks[11], (C, Cr), 0.2),             # torch Linear(Cr -> C)
    }


if __name__ == "__main__":
    B, C, H, W = 2, 32, 16, 16      # inplanes = planes = 32, stride = 1, no downsample
    reduction = 8                   # -> SE bottleneck of 4 channels

    key = jax.random.PRNGKey(0)
    kx, kp = jax.random.split(key)
    x = jax.random.normal(kx, (B, C, H, W), jnp.float32)
    params = make_params(kp, C, reduction)

    out = jax.block_until_ready(se_basic_block(x, params))
    ref = jax.block_until_ready(se_basic_block_ref(x, params))

    assert out.shape == (B, C, H, W)
    # bf16 MXU path vs f32 reference: check max error normalized by output scale.
    err = float(jnp.max(jnp.abs(out - ref)) / (jnp.max(jnp.abs(ref)) + 1e-6))
    assert err < 5e-2, f"normalized max abs diff = {err}"
    print("KERNEL_OK")
</pallas_src>

<mosaic_0001>
module attributes {stable_mosaic.version = 11 : i64} {
  func.func @_se_basic_block_kernel(%arg0: i32, %arg1: memref<9x256xf32, #tpu.memory_space<vmem>>, %arg2: memref<1x32x256xf32, #tpu.memory_space<vmem>>, %arg3: memref<32x288xbf16, #tpu.memory_space<vmem>>, %arg4: memref<32x1xf32, #tpu.memory_space<vmem>>, %arg5: memref<32x288xbf16, #tpu.memory_space<vmem>>, %arg6: memref<32x1xf32, #tpu.memory_space<vmem>>, %arg7: memref<32x4xf32, #tpu.memory_space<vmem>>, %arg8: memref<32x4xf32, #tpu.memory_space<vmem>>, %arg9: memref<1x32x256xf32, #tpu.memory_space<vmem>>, %arg10: memref<288x256xbf16, #tpu.memory_space<vmem>>) attributes {dimension_semantics = [#tpu.dimension_semantics<parallel>], iteration_bounds = array<i64: 2>, scalar_prefetch = 0 : i64, scratch_operands = 1 : i64, tpu.core_type = #tpu.core_type<tc>, window_params = [{pipeline_mode = #tpu.pipeline_mode<synchronous>, transform_indices = @transform_0, window_bounds = array<i64: 9, 256>}, {transform_indices = @transform_1, window_bounds = array<i64: 1, 32, 256>}, {pipeline_mode = #tpu.pipeline_mode<synchronous>, transform_indices = @transform_2, window_bounds = array<i64: 32, 288>}, {pipeline_mode = #tpu.pipeline_mode<synchronous>, transform_indices = @transform_3, window_bounds = array<i64: 32, 1>}, {pipeline_mode = #tpu.pipeline_mode<synchronous>, transform_indices = @transform_4, window_bounds = array<i64: 32, 288>}, {pipeline_mode = #tpu.pipeline_mode<synchronous>, transform_indices = @transform_5, window_bounds = array<i64: 32, 1>}, {pipeline_mode = #tpu.pipeline_mode<synchronous>, transform_indices = @transform_6, window_bounds = array<i64: 32, 4>}, {pipeline_mode = #tpu.pipeline_mode<synchronous>, transform_indices = @transform_7, window_bounds = array<i64: 32, 4>}, {transform_indices = @transform_8, window_bounds = array<i64: 1, 32, 256>}]} {
    %c0 = arith.constant 0 : index
    %c0_0 = arith.constant 0 : index
    %c0_1 = arith.constant 0 : index
    %0 = vector.load %arg2[%c0, %c0_0, %c0_1] : memref<1x32x256xf32, #tpu.memory_space<vmem>>, vector<1x32x256xf32>
    %1 = vector.shape_cast %0 : vector<1x32x256xf32> to vector<32x256xf32>
    %c17_i32 = arith.constant 17 : i32
    %2 = tpu.dynamic_rotate %1 by %c17_i32 dim 1 : vector<32x256xf32>, i32 -> vector<32x256xf32>
    %c0_2 = arith.constant 0 : index
    %c0_3 = arith.constant 0 : index
    %3 = vector.load %arg1[%c0_2, %c0_3] : memref<9x256xf32, #tpu.memory_space<vmem>>, vector<1x256xf32>
    %4 = vector.broadcast %3 : vector<1x256xf32> to vector<32x256xf32>
    %5 = arith.mulf %2, %4 : vector<32x256xf32>
    %6 = arith.truncf %5 : vector<32x256xf32> to vector<32x256xbf16>
    %c0_4 = arith.constant 0 : index
    %c0_5 = arith.constant 0 : index
    %7 = vector.load %arg10[%c0_4, %c0_5] : memref<288x256xbf16, #tpu.memory_space<vmem>>, vector<32x256xbf16>
    tpu.vector_store %arg10[%c0_4, %c0_5], %6 {strides = array<i32>} : memref<288x256xbf16, #tpu.memory_space<vmem>>, vector<32x256xbf16>,
    %c16_i32 = arith.constant 16 : i32
    %8 = tpu.dynamic_rotate %1 by %c16_i32 dim 1 : vector<32x256xf32>, i32 -> vector<32x256xf32>
    %c1 = arith.constant 1 : index
    %c0_6 = arith.constant 0 : index
    %9 = vector.load %arg1[%c1, %c0_6] : memref<9x256xf32, #tpu.memory_space<vmem>>, vector<1x256xf32>
    %10 = vector.broadcast %9 : vector<1x256xf32> to vector<32x256xf32>
    %11 = arith.mulf %8, %10 : vector<32x256xf32>
    %12 = arith.truncf %11 : vector<32x256xf32> to vector<32x256xbf16>
    %c32 = arith.constant 32 : index
    %c0_7 = arith.constant 0 : index
    %13 = vector.load %arg10[%c32, %c0_7] : memref<288x256xbf16, #tpu.memory_space<vmem>>, vector<32x256xbf16>
    tpu.vector_store %arg10[%c32, %c0_7], %12 {strides = array<i32>} : memref<288x256xbf16, #tpu.memory_space<vmem>>, vector<32x256xbf16>,
    %c15_i32 = arith.constant 15 : i32
    %14 = tpu.dynamic_rotate %1 by %c15_i32 dim 1 : vector<32x256xf32>, i32 -> vector<32x256xf32>
    %c2 = arith.constant 2 : index
    %c0_8 = arith.constant 0 : index
    %15 = vector.load %arg1[%c2, %c0_8] : memref<9x256xf32, #tpu.memory_space<vmem>>, vector<1x256xf32>
    %16 = vector.broadcast %15 : vector<1x256xf32> to vector<32x256xf32>
    %17 = arith.mulf %14, %16 : vector<32x256xf32>
    %18 = arith.truncf %17 : vector<32x256xf32> to vector<32x256xbf16>
    %c64 = arith.constant 64 : index
    %c0_9 = arith.constant 0 : index
    %19 = vector.load %arg10[%c64, %c0_9] : memref<288x256xbf16, #tpu.memory_space<vmem>>, vector<32x256xbf16>
    tpu.vector_store %arg10[%c64, %c0_9], %18 {strides = array<i32>} : memref<288x256xbf16, #tpu.memory_space<vmem>>, vector<32x256xbf16>,
    %c1_i32 = arith.constant 1 : i32
    %20 = tpu.dynamic_rotate %1 by %c1_i32 dim 1 : vector<32x256xf32>, i32 -> vector<32x256xf32>
    %c3 = arith.constant 3 : index
    %c0_10 = arith.constant 0 : index
    %21 = vector.load %arg1[%c3, %c0_10] : memref<9x256xf32, #tpu.memory_space<vmem>>, vector<1x256xf32>
    %22 = vector.broadcast %21 : vector<1x256xf32> to vector<32x256xf32>
    %23 = arith.mulf %20, %22 : vector<32x256xf32>
    %24 = arith.truncf %23 : vector<32x256xf32> to vector<32x256xbf16>
    %c96 = arith.constant 96 : index
    %c0_11 = arith.constant 0 : index
    %25 = vector.load %arg10[%c96, %c0_11] : memref<288x256xbf16, #tpu.memory_space<vmem>>, vector<32x256xbf16>
    tpu.vector_store %arg10[%c96, %c0_11], %24 {strides = array<i32>} : memref<288x256xbf16, #tpu.memory_space<vmem>>, vector<32x256xbf16>,
    %26 = arith.truncf %1 : vector<32x256xf32> to vector<32x256xbf16>
    %c128 = arith.constant 128 : index
    %c0_12 = arith.constant 0 : index
    %27 = vector.load %arg10[%c128, %c0_12] : memref<288x256xbf16, #tpu.memory_space<vmem>>, vector<32x256xbf16>
    tpu.vector_store %arg10[%c128, %c0_12], %26 {strides = array<i32>} : memref<288x256xbf16, #tpu.memory_space<vmem>>, vector<32x256xbf16>,
    %c255_i32 = arith.constant 255 : i32
    %28 = tpu.dynamic_rotate %1 by %c255_i32 dim 1 : vector<32x256xf32>, i32 -> vector<32x256xf32>
    %c5 = arith.constant 5 : index
    %c0_13 = arith.constant 0 : index
    %29 = vector.load %arg1[%c5, %c0_13] : memref<9x256xf32, #tpu.memory_space<vmem>>, vector<1x256xf32>
    %30 = vector.broadcast %29 : vector<1x256xf32> to vector<32x256xf32>
    %31 = arith.mulf %28, %30 : vector<32x256xf32>
    %32 = arith.truncf %31 : vector<32x256xf32> to vector<32x256xbf16>
    %c160 = arith.constant 160 : index
    %c0_14 = arith.constant 0 : index
    %33 = vector.load %arg10[%c160, %c0_14] : memref<288x256xbf16, #tpu.memory_space<vmem>>, vector<32x256xbf16>
    tpu.vector_store %arg10[%c160, %c0_14], %32 {strides = array<i32>} : memref<288x256xbf16, #tpu.memory_space<vmem>>, vector<32x256xbf16>,
    %c241_i32 = arith.constant 241 : i32
    %34 = tpu.dynamic_rotate %1 by %c241_i32 dim 1 : vector<32x256xf32>, i32 -> vector<32x256xf32>
    %c6 = arith.constant 6 : index
    %c0_15 = arith.constant 0 : index
    %35 = vector.load %arg1[%c6, %c0_15] : memref<9x256xf32, #tpu.memory_space<vmem>>, vector<1x256xf32>
    %36 = vector.broadcast %35 : vector<1x256xf32> to vector<32x256xf32>
    %37 = arith.mulf %34, %36 : vector<32x256xf32>
    %38 = arith.truncf %37 : vector<32x256xf32> to vector<32x256xbf16>
    %c192 = arith.constant 192 : index
    %c0_16 = arith.constant 0 : index
    %39 = vector.load %arg10[%c192, %c0_16] : memref<288x256xbf16, #tpu.memory_space<vmem>>, vector<32x256xbf16>
    tpu.vector_store %arg10[%c192, %c0_16], %38 {strides = array<i32>} : memref<288x256xbf16, #tpu.memory_space<vmem>>, vector<32x256xbf16>,
    %c240_i32 = arith.constant 240 : i32
    %40 = tpu.dynamic_rotate %1 by %c240_i32 dim 1 : vector<32x256xf32>, i32 -> vector<32x256xf32>
    %c7 = arith.constant 7 : index
    %c0_17 = arith.constant 0 : index
    %41 = vector.load %arg1[%c7, %c0_17] : memref<9x256xf32, #tpu.memory_space<vmem>>, vector<1x256xf32>
    %42 = vector.broadcast %41 : vector<1x256xf32> to vector<32x256xf32>
    %43 = arith.mulf %40, %42 : vector<32x256xf32>
    %44 = arith.truncf %43 : vector<32x256xf32> to vector<32x256xbf16>
    %c224 = arith.constant 224 : index
    %c0_18 = arith.constant 0 : index
    %45 = vector.load %arg10[%c224, %c0_18] : memref<288x256xbf16, #tpu.memory_space<vmem>>, vector<32x256xbf16>
    tpu.vector_store %arg10[%c224, %c0_18], %44 {strides = array<i32>} : memref<288x256xbf16, #tpu.memory_space<vmem>>, vector<32x256xbf16>,
    %c239_i32 = arith.constant 239 : i32
    %46 = tpu.dynamic_rotate %1 by %c239_i32 dim 1 : vector<32x256xf32>, i32 -> vector<32x256xf32>
    %c8 = arith.constant 8 : index
    %c0_19 = arith.constant 0 : index
    %47 = vector.load %arg1[%c8, %c0_19] : memref<9x256xf32, #tpu.memory_space<vmem>>, vector<1x256xf32>
    %48 = vector.broadcast %47 : vector<1x256xf32> to vector<32x256xf32>
    %49 = arith.mulf %46, %48 : vector<32x256xf32>
    %50 = arith.truncf %49 : vector<32x256xf32> to vector<32x256xbf16>
    %c256 = arith.constant 256 : index
    %c0_20 = arith.constant 0 : index
    %51 = vector.load %arg10[%c256, %c0_20] : memref<288x256xbf16, #tpu.memory_space<vmem>>, vector<32x256xbf16>
    tpu.vector_store %arg10[%c256, %c0_20], %50 {strides = array<i32>} : memref<288x256xbf16, #tpu.memory_space<vmem>>, vector<32x256xbf16>,
    %c0_21 = arith.constant 0 : index
    %c0_22 = arith.constant 0 : index
    %52 = vector.load %arg3[%c0_21, %c0_22] : memref<32x288xbf16, #tpu.memory_space<vmem>>, vector<32x288xbf16>
    %c0_23 = arith.constant 0 : index
    %c0_24 = arith.constant 0 : index
    %53 = vector.load %arg10[%c0_23, %c0_24] : memref<288x256xbf16, #tpu.memory_space<vmem>>, vector<288x256xbf16>
    %cst = arith.constant dense<0.000000e+00> : vector<32x256xf32>
    %54 = tpu.matmul %52, %53, %cst {dimension_numbers = #tpu.dot_dimension_numbers<[1], [0], [0], [1], [0, 0, 1, 1], [], []>} : vector<32x288xbf16>, vector<288x256xbf16>, vector<32x256xf32> -> vector<32x256xf32>
    %c0_25 = arith.constant 0 : index
    %c0_26 = arith.constant 0 : index
    %55 = vector.load %arg4[%c0_25, %c0_26] : memref<32x1xf32, #tpu.memory_space<vmem>>, vector<32x1xf32>
    %56 = vector.broadcast %55 : vector<32x1xf32> to vector<32x256xf32>
    %57 = arith.addf %54, %56 : vector<32x256xf32>
    %cst_27 = arith.constant 0.000000e+00 : f32
    %58 = vector.broadcast %cst_27 : f32 to vector<32x256xf32>
    %59 = arith.maximumf %57, %58 : vector<32x256xf32>
    %c17_i32_28 = arith.constant 17 : i32
    %60 = tpu.dynamic_rotate %59 by %c17_i32_28 dim 1 : vector<32x256xf32>, i32 -> vector<32x256xf32>
    %c0_29 = arith.constant 0 : index
    %c0_30 = arith.constant 0 : index
    %61 = vector.load %arg1[%c0_29, %c0_30] : memref<9x256xf32, #tpu.memory_space<vmem>>, vector<1x256xf32>
    %62 = vector.broadcast %61 : vector<1x256xf32> to vector<32x256xf32>
    %63 = arith.mulf %60, %62 : vector<32x256xf32>
    %64 = arith.truncf %63 : vector<32x256xf32> to vector<32x256xbf16>
    %c0_31 = arith.constant 0 : index
    %c0_32 = arith.constant 0 : index
    %65 = vector.load %arg10[%c0_31, %c0_32] : memref<288x256xbf16, #tpu.memory_space<vmem>>, vector<32x256xbf16>
    tpu.vector_store %arg10[%c0_31, %c0_32], %64 {strides = array<i32>} : memref<288x256xbf16, #tpu.memory_space<vmem>>, vector<32x256xbf16>,
    %c16_i32_33 = arith.constant 16 : i32
    %66 = tpu.dynamic_rotate %59 by %c16_i32_33 dim 1 : vector<32x256xf32>, i32 -> vector<32x256xf32>
    %c1_34 = arith.constant 1 : index
    %c0_35 = arith.constant 0 : index
    %67 = vector.load %arg1[%c1_34, %c0_35] : memref<9x256xf32, #tpu.memory_space<vmem>>, vector<1x256xf32>
    %68 = vector.broadcast %67 : vector<1x256xf32> to vector<32x256xf32>
    %69 = arith.mulf %66, %68 : vector<32x256xf32>
    %70 = arith.truncf %69 : vector<32x256xf32> to vector<32x256xbf16>
    %c32_36 = arith.constant 32 : index
    %c0_37 = arith.constant 0 : index
    %71 = vector.load %arg10[%c32_36, %c0_37] : memref<288x256xbf16, #tpu.memory_space<vmem>>, vector<32x256xbf16>
    tpu.vector_store %arg10[%c32_36, %c0_37], %70 {strides = array<i32>} : memref<288x256xbf16, #tpu.memory_space<vmem>>, vector<32x256xbf16>,
    %c15_i32_38 = arith.constant 15 : i32
    %72 = tpu.dynamic_rotate %59 by %c15_i32_38 dim 1 : vector<32x256xf32>, i32 -> vector<32x256xf32>
    %c2_39 = arith.constant 2 : index
    %c0_40 = arith.constant 0 : index
    %73 = vector.load %arg1[%c2_39, %c0_40] : memref<9x256xf32, #tpu.memory_space<vmem>>, vector<1x256xf32>
    %74 = vector.broadcast %73 : vector<1x256xf32> to vector<32x256xf32>
    %75 = arith.mulf %72, %74 : vector<32x256xf32>
    %76 = arith.truncf %75 : vector<32x256xf32> to vector<32x256xbf16>
    %c64_41 = arith.constant 64 : index
    %c0_42 = arith.constant 0 : index
    %77 = vector.load %arg10[%c64_41, %c0_42] : memref<288x256xbf16, #tpu.memory_space<vmem>>, vector<32x256xbf16>
    tpu.vector_store %arg10[%c64_41, %c0_42], %76 {strides = array<i32>} : memref<288x256xbf16, #tpu.memory_space<vmem>>, vector<32x256xbf16>,
    %c1_i32_43 = arith.constant 1 : i32
    %78 = tpu.dynamic_rotate %59 by %c1_i32_43 dim 1 : vector<32x256xf32>, i32 -> vector<32x256xf32>
    %c3_44 = arith.constant 3 : index
    %c0_45 = arith.constant 0 : index
    %79 = vector.load %arg1[%c3_44, %c0_45] : memref<9x256xf32, #tpu.memory_space<vmem>>, vector<1x256xf32>
    %80 = vector.broadcast %79 : vector<1x256xf32> to vector<32x256xf32>
    %81 = arith.mulf %78, %80 : vector<32x256xf32>
    %82 = arith.truncf %81 : vector<32x256xf32> to vector<32x256xbf16>
    %c96_46 = arith.constant 96 : index
    %c0_47 = arith.constant 0 : index
    %83 = vector.load %arg10[%c96_46, %c0_47] : memref<288x256xbf16, #tpu.memory_space<vmem>>, vector<32x256xbf16>
    tpu.vector_store %arg10[%c96_46, %c0_47], %82 {strides = array<i32>} : memref<288x256xbf16, #tpu.memory_space<vmem>>, vector<32x256xbf16>,
    %84 = arith.truncf %59 : vector<32x256xf32> to vector<32x256xbf16>
    %c128_48 = arith.constant 128 : index
    %c0_49 = arith.constant 0 : index
    %85 = vector.load %arg10[%c128_48, %c0_49] : memref<288x256xbf16, #tpu.memory_space<vmem>>, vector<32x256xbf16>
    tpu.vector_store %arg10[%c128_48, %c0_49], %84 {strides = array<i32>} : memref<288x256xbf16, #tpu.memory_space<vmem>>, vector<32x256xbf16>,
    %c255_i32_50 = arith.constant 255 : i32
    %86 = tpu.dynamic_rotate %59 by %c255_i32_50 dim 1 : vector<32x256xf32>, i32 -> vector<32x256xf32>
    %c5_51 = arith.constant 5 : index
    %c0_52 = arith.constant 0 : index
    %87 = vector.load %arg1[%c5_51, %c0_52] : memref<9x256xf32, #tpu.memory_space<vmem>>, vector<1x256xf32>
    %88 = vector.broadcast %87 : vector<1x256xf32> to vector<32x256xf32>
    %89 = arith.mulf %86, %88 : vector<32x256xf32>
    %90 = arith.truncf %89 : vector<32x256xf32> to vector<32x256xbf16>
    %c160_53 = arith.constant 160 : index
    %c0_54 = arith.constant 0 : index
    %91 = vector.load %arg10[%c160_53, %c0_54] : memref<288x256xbf16, #tpu.memory_space<vmem>>, vector<32x256xbf16>
    tpu.vector_store %arg10[%c160_53, %c0_54], %90 {strides = array<i32>} : memref<288x256xbf16, #tpu.memory_space<vmem>>, vector<32x256xbf16>,
    %c241_i32_55 = arith.constant 241 : i32
    %92 = tpu.dynamic_rotate %59 by %c241_i32_55 dim 1 : vector<32x256xf32>, i32 -> vector<32x256xf32>
    %c6_56 = arith.constant 6 : index
    %c0_57 = arith.constant 0 : index
    %93 = vector.load %arg1[%c6_56, %c0_57] : memref<9x256xf32, #tpu.memory_space<vmem>>, vector<1x256xf32>
    %94 = vector.broadcast %93 : vector<1x256xf32> to vector<32x256xf32>
    %95 = arith.mulf %92, %94 : vector<32x256xf32>
    %96 = arith.truncf %95 : vector<32x256xf32> to vector<32x256xbf16>
    %c192_58 = arith.constant 192 : index
    %c0_59 = arith.constant 0 : index
    %97 = vector.load %arg10[%c192_58, %c0_59] : memref<288x256xbf16, #tpu.memory_space<vmem>>, vector<32x256xbf16>
    tpu.vector_store %arg10[%c192_58, %c0_59], %96 {strides = array<i32>} : memref<288x256xbf16, #tpu.memory_space<vmem>>, vector<32x256xbf16>,
    %c240_i32_60 = arith.constant 240 : i32
    %98 = tpu.dynamic_rotate %59 by %c240_i32_60 dim 1 : vector<32x256xf32>, i32 -> vector<32x256xf32>
    %c7_61 = arith.constant 7 : index
    %c0_62 = arith.constant 0 : index
    %99 = vector.load %arg1[%c7_61, %c0_62] : memref<9x256xf32, #tpu.memory_space<vmem>>, vector<1x256xf32>
    %100 = vector.broadcast %99 : vector<1x256xf32> to vector<32x256xf32>
    %101 = arith.mulf %98, %100 : vector<32x256xf32>
    %102 = arith.truncf %101 : vector<32x256xf32> to vector<32x256xbf16>
    %c224_63 = arith.constant 224 : index
    %c0_64 = arith.constant 0 : index
    %103 = vector.load %arg10[%c224_63, %c0_64] : memref<288x256xbf16, #tpu.memory_space<vmem>>, vector<32x256xbf16>
    tpu.vector_store %arg10[%c224_63, %c0_64], %102 {strides = array<i32>} : memref<288x256xbf16, #tpu.memory_space<vmem>>, vector<32x256xbf16>,
    %c239_i32_65 = arith.constant 239 : i32
    %104 = tpu.dynamic_rotate %59 by %c239_i32_65 dim 1 : vector<32x256xf32>, i32 -> vector<32x256xf32>
    %c8_66 = arith.constant 8 : index
    %c0_67 = arith.constant 0 : index
    %105 = vector.load %arg1[%c8_66, %c0_67] : memref<9x256xf32, #tpu.memory_space<vmem>>, vector<1x256xf32>
    %106 = vector.broadcast %105 : vector<1x256xf32> to vector<32x256xf32>
    %107 = arith.mulf %104, %106 : vector<32x256xf32>
    %108 = arith.truncf %107 : vector<32x256xf32> to vector<32x256xbf16>
    %c256_68 = arith.constant 256 : index
    %c0_69 = arith.constant 0 : index
    %109 = vector.load %arg10[%c256_68, %c0_69] : memref<288x256xbf16, #tpu.memory_space<vmem>>, vector<32x256xbf16>
    tpu.vector_store %arg10[%c256_68, %c0_69], %108 {strides = array<i32>} : memref<288x256xbf16, #tpu.memory_space<vmem>>, vector<32x256xbf16>,
    %c0_70 = arith.constant 0 : index
    %c0_71 = arith.constant 0 : index
    %110 = vector.load %arg5[%c0_70, %c0_71] : memref<32x288xbf16, #tpu.memory_space<vmem>>, vector<32x288xbf16>
    %c0_72 = arith.constant 0 : index
    %c0_73 = arith.constant 0 : index
    %111 = vector.load %arg10[%c0_72, %c0_73] : memref<288x256xbf16, #tpu.memory_space<vmem>>, vector<288x256xbf16>
    %cst_74 = arith.constant dense<0.000000e+00> : vector<32x256xf32>
    %112 = tpu.matmul %110, %111, %cst_74 {dimension_numbers = #tpu.dot_dimension_numbers<[1], [0], [0], [1], [0, 0, 1, 1], [], []>} : vector<32x288xbf16>, vector<288x256xbf16>, vector<32x256xf32> -> vector<32x256xf32>
    %c0_75 = arith.constant 0 : index
    %c0_76 = arith.constant 0 : index
    %113 = vector.load %arg6[%c0_75, %c0_76] : memref<32x1xf32, #tpu.memory_space<vmem>>, vector<32x1xf32>
    %114 = vector.broadcast %113 : vector<32x1xf32> to vector<32x256xf32>
    %115 = arith.addf %112, %114 : vector<32x256xf32>
    %cst_77 = arith.constant dense<0.000000e+00> : vector<32xf32>
    %116 = vector.multi_reduction <add>, %115, %cst_77 [1] : vector<32x256xf32> to vector<32xf32>
    %117 = vector.shape_cast %116 : vector<32xf32> to vector<32x1xf32>
    %cst_78 = arith.constant 2.560000e+02 : f32
    %118 = vector.broadcast %cst_78 : f32 to vector<32x1xf32>
    %119 = arith.divf %117, %118 : vector<32x1xf32>
    %c0_79 = arith.constant 0 : index
    %c0_80 = arith.constant 0 : index
    %120 = vector.load %arg7[%c0_79, %c0_80] : memref<32x4xf32, #tpu.memory_space<vmem>>, vector<32x4xf32>
    %121 = vector.broadcast %119 : vector<32x1xf32> to vector<32x4xf32>
    %122 = arith.mulf %120, %121 : vector<32x4xf32>
    %cst_81 = arith.constant dense<0.000000e+00> : vector<4xf32>
    %123 = vector.multi_reduction <add>, %122, %cst_81 [0] : vector<32x4xf32> to vector<4xf32>
    %124 = vector.shape_cast %123 : vector<4xf32> to vector<1x4xf32>
    %cst_82 = arith.constant 0.000000e+00 : f32
    %125 = vector.broadcast %cst_82 : f32 to vector<1x4xf32>
    %126 = arith.maximumf %124, %125 : vector<1x4xf32>
    %c0_83 = arith.constant 0 : index
    %c0_84 = arith.constant 0 : index
    %127 = vector.load %arg8[%c0_83, %c0_84] : memref<32x4xf32, #tpu.memory_space<vmem>>, vector<32x4xf32>
    %128 = vector.broadcast %126 : vector<1x4xf32> to vector<32x4xf32>
    %129 = arith.mulf %127, %128 : vector<32x4xf32>
    %cst_85 = arith.constant dense<0.000000e+00> : vector<32xf32>
    %130 = vector.multi_reduction <add>, %129, %cst_85 [1] : vector<32x4xf32> to vector<32xf32>
    %131 = vector.shape_cast %130 : vector<32xf32> to vector<32x1xf32>
    %132 = arith.negf %131 : vector<32x1xf32>
    %133 = math.exp %132 : vector<32x1xf32>
    %cst_86 = arith.constant 1.000000e+00 : f32
    %134 = vector.broadcast %cst_86 : f32 to vector<32x1xf32>
    %135 = arith.addf %134, %133 : vector<32x1xf32>
    %136 = arith.divf %134, %135 : vector<32x1xf32>
    %137 = vector.broadcast %136 : vector<32x1xf32> to vector<32x256xf32>
    %138 = arith.mulf %115, %137 : vector<32x256xf32>
    %c0_87 = arith.constant 0 : index
    %c0_88 = arith.constant 0 : index
    %c0_89 = arith.constant 0 : index
    %139 = vector.load %arg2[%c0_87, %c0_88, %c0_89] : memref<1x32x256xf32, #tpu.memory_space<vmem>>, vector<1x32x256xf32>
    %140 = vector.shape_cast %139 : vector<1x32x256xf32> to vector<32x256xf32>
    %141 = arith.addf %138, %140 : vector<32x256xf32>
    %cst_90 = arith.constant 0.000000e+00 : f32
    %142 = vector.broadcast %cst_90 : f32 to vector<32x256xf32>
    %143 = arith.maximumf %141, %142 : vector<32x256xf32>
    %144 = vector.shape_cast %143 : vector<32x256xf32> to vector<1x32x256xf32>
    %c0_91 = arith.constant 0 : index
    %c0_92 = arith.constant 0 : index
    %c0_93 = arith.constant 0 : index
    %145 = vector.load %arg9[%c0_91, %c0_92, %c0_93] : memref<1x32x256xf32, #tpu.memory_space<vmem>>, vector<1x32x256xf32>
    tpu.vector_store %arg9[%c0_91, %c0_92, %c0_93], %144 {strides = array<i32>} : memref<1x32x256xf32, #tpu.memory_space<vmem>>, vector<1x32x256xf32>,
    return
  }
  func.func @transform_0(%arg0: i32) -> (i32, i32) {
    %c0_i32 = arith.constant 0 : i32
    %c0_i32_0 = arith.constant 0 : i32
    %c0_i32_1 = arith.constant 0 : i32
    return %c0_i32, %c0_i32_0 : i32, i32
  }
  func.func @transform_1(%arg0: i32) -> (i32, i32, i32) {
    %c0_i32 = arith.constant 0 : i32
    %c0_i32_0 = arith.constant 0 : i32
    %c0_i32_1 = arith.constant 0 : i32
    return %arg0, %c0_i32, %c0_i32_0 : i32, i32, i32
  }
  func.func @transform_2(%arg0: i32) -> (i32, i32) {
    %c0_i32 = arith.constant 0 : i32
    %c0_i32_0 = arith.constant 0 : i32
    %c0_i32_1 = arith.constant 0 : i32
    return %c0_i32, %c0_i32_0 : i32, i32
  }
  func.func @transform_3(%arg0: i32) -> (i32, i32) {
    %c0_i32 = arith.constant 0 : i32
    %c0_i32_0 = arith.constant 0 : i32
    %c0_i32_1 = arith.constant 0 : i32
    return %c0_i32, %c0_i32_0 : i32, i32
  }
  func.func @transform_4(%arg0: i32) -> (i32, i32) {
    %c0_i32 = arith.constant 0 : i32
    %c0_i32_0 = arith.constant 0 : i32
    %c0_i32_1 = arith.constant 0 : i32
    return %c0_i32, %c0_i32_0 : i32, i32
  }
  func.func @transform_5(%arg0: i32) -> (i32, i32) {
    %c0_i32 = arith.constant 0 : i32
    %c0_i32_0 = arith.constant 0 : i32
    %c0_i32_1 = arith.constant 0 : i32
    return %c0_i32, %c0_i32_0 : i32, i32
  }
  func.func @transform_6(%arg0: i32) -> (i32, i32) {
    %c0_i32 = arith.constant 0 : i32
    %c0_i32_0 = arith.constant 0 : i32
    %c0_i32_1 = arith.constant 0 : i32
    return %c0_i32, %c0_i32_0 : i32, i32
  }
  func.func @transform_7(%arg0: i32) -> (i32, i32) {
    %c0_i32 = arith.constant 0 : i32
    %c0_i32_0 = arith.constant 0 : i32
    %c0_i32_1 = arith.constant 0 : i32
    return %c0_i32, %c0_i32_0 : i32, i32
  }
  func.func @transform_8(%arg0: i32) -> (i32, i32, i32) {
    %c0_i32 = arith.constant 0 : i32
    %c0_i32_0 = arith.constant 0 : i32
    %c0_i32_1 = arith.constant 0 : i32
    return %arg0, %c0_i32, %c0_i32_0 : i32, i32, i32
  }
}

</mosaic_0001>

<bundles_post_ra>
// kernel: tpu_custom_call.1
= control target key start
LH: loop header
LB: loop body
LE: loop exit
PB: predicated region body
PF: predicated region fallthrough
CT: control target
= control target key end

     0   :  { %s3307_s0 = inlined_call_operand.hbm [shape: f32[9,256], index: 0, kind: input, shape index: {}]   ;;  %s3308_s1 = inlined_call_operand.vmem [shape: f32[2,32,256], index: 1, kind: input, shape index: {}]   ;;  %s3309_s2 = inlined_call_operand.hbm [shape: bf16[32,288], index: 2, kind: input, shape index: {}]   ;;  %s3310_s3 = inlined_call_operand.vmem [shape: f32[32,1], index: 3, kind: input, shape index: {}]   ;;  %s3311_s4 = inlined_call_operand.hbm [shape: bf16[32,288], index: 4, kind: input, shape index: {}]   ;;  %s3312_s5 = inlined_call_operand.vmem [shape: f32[32,1], index: 5, kind: input, shape index: {}]   ;;  %s3313_s6 = inlined_call_operand.vmem [shape: f32[32,4], index: 6, kind: input, shape index: {}]   ;;  %s3314_s7 = inlined_call_operand.vmem [shape: f32[32,4], index: 7, kind: input, shape index: {}]   ;;  %s3315_s8 = inlined_call_operand.hbm [shape: f32[2,32,256], index: 8, kind: output, shape index: {}]  }
   0x1   :  { %3324 = sst [smem:[#allocation16_spill]] %s3309_s2 }
   0x2   :  { %13 = vsyncpa [#allocation4], 0 }
   0x3   :  { %14 = vsyncpa [#allocation7], 0 }
   0x4   :  { %15 = vsyncpa [#allocation5], 0 }
   0x5   :  { %17 = vsyncpa [#allocation5 + $0x1], 0  ;;  %s2291_s27 = smov 0   ;;  %s2293_s28 = smov 0  }
   0x6   :  { %s2295_s29 = smov 0   ;;  %s2297_s30 = smov 0  }
   0x7 LB: > { %3325 = sst [smem:[#allocation13_spill]] %s2222_s29  ;;  %s2312_s9 = sadd.s32 4294967295, %s2226_s30   ;;  %s2226_s30 = sphi %s2297_s30, %s3343_s30   ;;  %s2222_s29 = sphi %s2295_s29, %s3345_s29   ;;  %s2218_s28 = sphi %s2293_s28, %s3347_s28   ;;  %s2214_s27 = sphi %s2291_s27, %s3346_s27  }
   0x8   : > { %s1882_s10 = sadd.s32 4294967294, %s2226_s30   ;;  %s2316_s11 = sadd.s32 1, %s2226_s30  }
   0x9   : > { %3326 = sst [smem:[#allocation14_spill]] %s2316_s11  ;;  %s203_s12 = sadd.s32 1, %s2222_s29 }
   0xa   : > { %s200_s13 = ssub.s32 %s2226_s30, %s2316_s11  ;;  %p213_p0 = scmp.ne.s32.totalorder %s2222_s29, %s2218_s28 }
   0xb   : > { %p201_p1 = scmp.eq.s32.totalorder %s200_s13, 0  ;;  %p214_p2 = scmp.eq.s32.totalorder %s2312_s9, 1 }
   0xc   : > { %p219_p3 = scmp.ne.s32.totalorder %s2218_s28, %s2214_s27  ;;  %p220_p4 = scmp.eq.s32.totalorder %s1882_s10, 1 }
   0xd   : > { %s2327_s14 = scalar_select %p201_p1, %s2222_s29, %s203_s12  }
   0xe   : > { %p2329_p5 = por %p214_p2, %p213_p0  ;;  %p2333_p6 = por %p220_p4, %p219_p3 }
   0xf   : > { %3327 = sst [smem:[#allocation15_spill]] %s2327_s14  ;;  %p1883_p7 = scmp.ge.s32.totalorder %s2226_s30, 1 }
  0x10   : > { %s3328_s15 = scalar_select %p2329_p5, 1, 0 }
  0x11   : > { %s3329_s16 = scalar_select %p2333_p6, 1, 0 }
  0x12   : > { %p227_p8 = scmp.lt.s32.totalorder %s2226_s30, 3  ;;  %p3316_p9 = scmp.eq.s32.totalorder %s2312_s9, 0 }
  0x13   : > { %s2228_s18 = smov [#allocation6]   ;;  %s2229_s21 = smov [#allocation3]  }
  0x14   : > { %p2340_p10 = pnand %p1883_p7, %p227_p8  ;;  %s252_s19 = sshll.u32 %s2228_s18, 4  ;;  %s253_s19 = int_to_ptr.vmem [resolvable:$true] %s252_s19 }
  0x15   : > { %s239_s22 = sshll.u32 %s2229_s21, 4  ;;  %s3332_s2 = sld [smem:[#allocation16_spill]]  ;;  %s2352_s22 = int_to_ptr.vmem [resolvable:$true] %s239_s22 }
  0x16   : > { %s3330_s17 = scalar_select %p2340_p10, 1, 0 }
  0x17   : > { %p1968_p11 = pneg %p2340_p10 }
  0x19   : > { %p2348_p12 = pnand %p3316_p9, %p1968_p11 }
  0x1b   : > { %s2072_s25 = scalar_lea.hbm %s3332_s2, 768  ;;  %p2362_p0 = pneg %p2348_p12 }
  0x1c   : > { %p2073_p13 = scmp.ne.s32.totalorder %s3332_s2, %s2072_s25  ;;  %p2079_p3 = scmp.lt.u32.totalorder %s2072_s25, %s3332_s2 }
  0x1e   : > { %p2075_p1 = pnand %p2362_p0, %p2073_p13 }
  0x20   : > { %p2076_p2 = pneg %p2075_p1 }
  0x22   : > { %p2081_p4 = pnand %p2079_p3, %p2076_p2 }
  0x24   : > { %2084 = shalt.err (!%p2081_p4)
}
  0x25   : > { %s2085_s21 = scalar_lea.vmem %s253_s19, 768  ;;  %p2093_p9 = scmp.lt.s32.totalorder %s253_s19, %s253_s19 }
  0x26   : > { %p2086_p7 = scmp.ne.s32.totalorder %s253_s19, %s2085_s21  ;;  %p2094_p6 = scmp.lt.s32.totalorder %s2085_s21, %s2085_s21 }
  0x28   : > { %p2088_p8 = pnand %p2086_p7, %p2362_p0  ;;  %p2095_p5 = por %p2094_p6, %p2093_p9 }
  0x2a   : > { %p2089_p11 = pneg %p2088_p8 }
  0x2c   : > { %p2096_p10 = pnand %p2095_p5, %p2089_p11 }
  0x2e   : > { %2099 = shalt.err (!%p2096_p10)
}
  0x2f   : > { %s3322_s23 = smov 192   ;;  %s3323_s24 = smov 12  }
  0x30   : > { %1974 = dma.hbm_to_vmem [thread:$0]  (!%p2348_p12), %s3332_s2, 768, %s253_s19, [#allocation7], %s3322_s23, %s3322_s23, %s3323_s24  }
  0x31   : > { %s2100_s18 = scalar_lea.hbm %s3307_s0, 512 }
  0x32   : > { %p2101_p5 = scmp.ne.s32.totalorder %s3307_s0, %s2100_s18  ;;  %p2107_p10 = scmp.lt.u32.totalorder %s2100_s18, %s3307_s0 }
  0x34   : > { %p2103_p6 = pnand %p2101_p5, %p2362_p0 }
  0x36   : > { %p2104_p9 = pneg %p2103_p6 }
  0x38   : > { %p2109_p13 = pnand %p2107_p10, %p2104_p9 }
  0x3a   : > { %2112 = shalt.err (!%p2109_p13)
}
  0x3b   : > { %s2113_s19 = scalar_lea.vmem %s2352_s22, 512  ;;  %p2121_p4 = scmp.lt.s32.totalorder %s2352_s22, %s2352_s22 }
  0x3c   : > { %p2114_p1 = scmp.ne.s32.totalorder %s2352_s22, %s2113_s19  ;;  %p2122_p7 = scmp.lt.s32.totalorder %s2113_s19, %s2113_s19 }
  0x3e   : > { %p2116_p2 = pnand %p2114_p1, %p2362_p0  ;;  %p2123_p8 = por %p2122_p7, %p2121_p4 }
  0x40   : > { %p2117_p3 = pneg %p2116_p2 }
  0x42   : > { %p2124_p11 = pnand %p2123_p8, %p2117_p3 }
  0x44   : > { %2127 = shalt.err (!%p2124_p11)
}
  0x45   : > { %s2232_s14 = smov 256   ;;  %s2233_s29 = smov 16  }
  0x46   : > { %1971 = dma.hbm_to_vmem [thread:$0]  (!%p2348_p12), %s3307_s0, 512, %s2352_s22, [#allocation4], %s2232_s14, %s2232_s14, %s2233_s29  }
  0x47   : > { %s2234_s26 = smov [#allocation8]   ;;  %s2128_s21 = scalar_lea.hbm %s3311_s4, 768 }
  0x48   : > { %s268_s10 = sshll.u32 %s2234_s26, 4  ;;  %p2129_p5 = scmp.ne.s32.totalorder %s3311_s4, %s2128_s21  ;;  %s269_s10 = int_to_ptr.vmem [resolvable:$true] %s268_s10 }
  0x49   : > { %p2135_p10 = scmp.lt.u32.totalorder %s2128_s21, %s3311_s4 }
  0x4a   : > { %p2131_p6 = pnand %p2129_p5, %p2362_p0 }
  0x4c   : > { %p2132_p9 = pneg %p2131_p6 }
  0x4e   : > { %p2137_p13 = pnand %p2135_p10, %p2132_p9 }
  0x50   : > { %2140 = shalt.err (!%p2137_p13)
}
  0x51   : > { %s2141_s22 = scalar_lea.vmem %s269_s10, 768  ;;  %p2149_p4 = scmp.lt.s32.totalorder %s269_s10, %s269_s10 }
  0x52   : > { %p2142_p1 = scmp.ne.s32.totalorder %s269_s10, %s2141_s22  ;;  %p2150_p7 = scmp.lt.s32.totalorder %s2141_s22, %s2141_s22 }
  0x54   : > { %p2144_p2 = pnand %p2142_p1, %p2362_p0  ;;  %p2151_p8 = por %p2150_p7, %p2149_p4 }
  0x56   : > { %p2145_p3 = pneg %p2144_p2 }
  0x58   : > { %p2152_p11 = pnand %p2151_p8, %p2145_p3 }
  0x5a   : > { %2155 = shalt.err (!%p2152_p11)
}
  0x5b   : > { %s3334_s23 = smov 12   ;;  %s3335_s14 = smov 192  }
  0x5c   : > { %1977 = dma.hbm_to_vmem [thread:$0]  (!%p2348_p12), %s3311_s4, 768, %s269_s10, [#allocation7], %s3335_s14, %s3335_s14, %s3334_s23  }
  0x5d   : > { %p3336_p5 = scmp.ne.s32.totalorder %s3330_s17, 0 }
  0x5e   : > { %p3337_p0 = scmp.eq.s32.totalorder (!%p3336_p5), %s2312_s9, 0 }
  0x5f   : > { %301 = sbr.rel (%p3336_p5) target bundleno = 1414 (0x586), region = 52 }
  0x66   : > { %2201 = dma.done.wait (%p3337_p0), [#allocation4], 512   ;;  %p3338_p6 = pmov %p3337_p0 }
  0x67   : > { %p3339_p9 = pmov %p3337_p0 }
  0x68   : > { %2203 = vsyncadd (%p3338_p6), [#allocation4], 4294966784 }
  0x69   : > { %2205 = dma.done.wait (%p3339_p9), [#allocation7], 1536   ;;  %p3340_p10 = pmov %p3337_p0 }
  0x6a   : > { %p343_p13 = scmp.lt.s32.totalorder %s2312_s9, 1  ;;  %s2235_s25 = smov 17   ;;  %v2042_v8 = vld [vmem:[#allocation6 + $0x4] ss:$12 sps:$4 sm:$0xff]   ;;  %v373_v9 = vlaneseq  ;;  %v2243_v23 = vmov 0   ;;  %v843_v44 = vld [vmem:[%s3310_s3 + $0x8] sm:$0xff] }
  0x6b   : > { %2207 = vsyncadd (%p3340_p10), [#allocation7], 4294965760  ;;  %s2236_s26 = smov 16   ;;  %s2237_s10 = smov 15   ;;  %935 = vmatprep.mubr.bf16.mxu0 %v2042_v8  ;;  %2039 = vset.pattern.permute.xlu1 %v2243_v23  ;;  %v842_v45 = vld [vmem:[%s3310_s3] sm:$0xff]  ;;  %v844_v51 = vld [vmem:[%s3310_s3 + $0x10] sm:$0xff] }
  0x6c   : > { %s344_s20 = scalar_select %p343_p13, %s2312_s9, 1  ;;  %v387_v10 = vshrl.u32 %v373_v9, 7  ;;  %v2578_v11 = vand.u32 127, %v373_v9  ;;  %v384_v14 = vld [vmem:[#allocation3] ss:$8 sm:$0x3]  ;;  %2038 = vset.pattern.permute.xlu0 %v2243_v23 }
  0x6d   : > { %s2238_s13 = smov 1   ;;  %s2239_s18 = smov 127   ;;  %v438_v46 = vld [vmem:[#allocation3 + $0x1] ss:$8 sm:$0x3]  ;;  %v845_v52 = vld [vmem:[%s3310_s3 + $0x18] sm:$0xff] }
  0x6e   : > { %s1920_s12 = sshll.u32 %s344_s20, 6  ;;  %s2240_s21 = smov 113   ;;  %v2580_v12 = vsub.s32 1, %v387_v10  ;;  %v2586_v13 = vsub.s32 0, %v387_v10  ;;  %vm375_vm0 = vcmp.lt.s32.totalorder %v2578_v11, 17  ;;  %vm428_vm1 = vcmp.lt.s32.totalorder %v2578_v11, 16 }
  0x6f   : > { %s2440_s11 = scalar_lea.vmem %s3308_s1, %s1920_s12  ;;  %s2241_s19 = smov 112   ;;  %vm482_vm2 = vcmp.lt.s32.totalorder %v2578_v11, 15  ;;  %vm536_vm3 = vcmp.lt.s32.totalorder %v2578_v11, 1  ;;  %vm598_vm4 = vcmp.lt.s32.totalorder %v2578_v11, 127  ;;  %vm652_vm5 = vcmp.lt.s32.totalorder %v2578_v11, 113 }
  0x70   : > { %v2443_v0 = vld [vmem:[%s2440_s11 + $0x8] sm:$0xff]  ;;  %v2446_v1 = vld [vmem:[%s2440_s11] sm:$0xff]  ;;  %v2453_v2 = vld [vmem:[%s2440_s11 + $0x18] sm:$0xff]  ;;  %s2242_s22 = smov 111   ;;  %v393_v17 = vrot.slane %v384_v14, %v2580_v12  ;;  %v389_v19 = vrot.slane %v384_v14, %v2586_v13  ;;  %v443_v53 = vrot.slane %v438_v46, %v2586_v13  ;;  %v447_v54 = vrot.slane %v438_v46, %v2580_v12  ;;  %s340_s2 = sand.u32 1, %s2218_s28  }
  0x71   : > { %365 = vrot.lane.b32.xlu1 %v2443_v0, %s2235_s25  ;;  %357 = vrot.lane.b32.xlu0 %v2446_v1, %s2235_s25  ;;  %v2456_v3 = vld [vmem:[%s2440_s11 + $0x10] sm:$0xff]  ;;  %v2466_v5 = vld [vmem:[%s2440_s11 + $0x20] sm:$0xff]  ;;  %vm706_vm6 = vcmp.lt.s32.totalorder %v2578_v11, 112  ;;  %vm760_vm7 = vcmp.lt.s32.totalorder %v2578_v11, 111  ;;  %vm896_vm8 = vcmask 261120   ;;  %vm1676_vm9 = vcmask 31744  }
  0x72   : > { %v2459_v4 = vld [vmem:[%s2440_s11 + $0x30] sm:$0xff]  ;;  %v2473_v6 = vld [vmem:[%s2440_s11 + $0x38] sm:$0xff]  ;;  %v2476_v7 = vld [vmem:[%s2440_s11 + $0x28] sm:$0xff]  ;;  %s1892_s24 = sshll.u32 %s340_s2, 6  ;;  %s1921_s20 = sshll.u32 %s2312_s9, 10 }
  0x73   : > { %s342_s12 = scalar_lea.vmem [#allocation9], %s1892_s24  ;;  %s3265_s9 = scalar_lea.sflag [#allocation5], %s340_s2 }
  0x74   : > { %s1789_s29 = sshll.u32 %s342_s12, 4  ;;  %p3341_p1 = scmp.ne.s32.totalorder %s3328_s15, 0  ;;  %s3261_s29 = int_to_ptr.vmem [resolvable:$true] %s1789_s29 }
  0x75   : > { %367 = vrot.lane.b32.xlu1 %v2453_v2, %s2235_s25  ;;  %359 = vrot.lane.b32.xlu0 %v2456_v3, %s2235_s25 }
  0x79   : > { %363 = vrot.lane.b32.xlu1 %v2459_v4, %s2235_s25  ;;  %361 = vrot.lane.b32.xlu0 %v2466_v5, %s2235_s25 }
  0x7d   : > { %371 = vrot.lane.b32.xlu1 %v2473_v6, %s2235_s25  ;;  %369 = vrot.lane.b32.xlu0 %v2476_v7, %s2235_s25 }
  0x81   : > { %414 = vrot.lane.b32.xlu1 %v2456_v3, %s2236_s26  ;;  %412 = vrot.lane.b32.xlu0 %v2446_v1, %s2236_s26 }
  0x85   : > { %422 = vrot.lane.b32.xlu1 %v2453_v2, %s2236_s26  ;;  %420 = vrot.lane.b32.xlu0 %v2443_v0, %s2236_s26 }
  0x89   : > { %418 = vrot.lane.b32.xlu1 %v2459_v4, %s2236_s26  ;;  %416 = vrot.lane.b32.xlu0 %v2466_v5, %s2236_s26 }
  0x8d   : > { %426 = vrot.lane.b32.xlu1 %v2473_v6, %s2236_s26  ;;  %424 = vrot.lane.b32.xlu0 %v2476_v7, %s2236_s26 }
  0x91   : > { %468 = vrot.lane.b32.xlu1 %v2456_v3, %s2237_s10  ;;  %466 = vrot.lane.b32.xlu0 %v2446_v1, %s2237_s10 }
  0x95   : > { %476 = vrot.lane.b32.xlu1 %v2453_v2, %s2237_s10  ;;  %474 = vrot.lane.b32.xlu0 %v2443_v0, %s2237_s10 }
  0x99   : > { %472 = vrot.lane.b32.xlu1 %v2459_v4, %s2237_s10  ;;  %470 = vrot.lane.b32.xlu0 %v2466_v5, %s2237_s10 }
  0x9d   : > { %480 = vrot.lane.b32.xlu1 %v2473_v6, %s2237_s10  ;;  %478 = vrot.lane.b32.xlu0 %v2476_v7, %s2237_s10 }
  0xa1   : > { %522 = vrot.lane.b32.xlu1 %v2456_v3, %s2238_s13  ;;  %520 = vrot.lane.b32.xlu0 %v2446_v1, %s2238_s13 }
  0xa5   : > { %530 = vrot.lane.b32.xlu1 %v2453_v2, %s2238_s13  ;;  %528 = vrot.lane.b32.xlu0 %v2443_v0, %s2238_s13 }
  0xa9   : > { %526 = vrot.lane.b32.xlu1 %v2459_v4, %s2238_s13  ;;  %524 = vrot.lane.b32.xlu0 %v2466_v5, %s2238_s13 }
  0xad   : > { %534 = vrot.lane.b32.xlu1 %v2473_v6, %s2238_s13  ;;  %532 = vrot.lane.b32.xlu0 %v2476_v7, %s2238_s13 }
  0xb1   : > { %584 = vrot.lane.b32.xlu1 %v2456_v3, %s2239_s18  ;;  %582 = vrot.lane.b32.xlu0 %v2446_v1, %s2239_s18 }
  0xb5   : > { %592 = vrot.lane.b32.xlu1 %v2453_v2, %s2239_s18  ;;  %590 = vrot.lane.b32.xlu0 %v2443_v0, %s2239_s18 }
  0xb9   : > { %588 = vrot.lane.b32.xlu1 %v2459_v4, %s2239_s18  ;;  %586 = vrot.lane.b32.xlu0 %v2466_v5, %s2239_s18 }
  0xbd   : > { %596 = vrot.lane.b32.xlu1 %v2473_v6, %s2239_s18  ;;  %594 = vrot.lane.b32.xlu0 %v2476_v7, %s2239_s18 }
  0xc1   : > { %638 = vrot.lane.b32.xlu1 %v2456_v3, %s2240_s21  ;;  %636 = vrot.lane.b32.xlu0 %v2446_v1, %s2240_s21 }
  0xc5   : > { %646 = vrot.lane.b32.xlu1 %v2453_v2, %s2240_s21  ;;  %644 = vrot.lane.b32.xlu0 %v2443_v0, %s2240_s21 }
  0xc9   : > { %642 = vrot.lane.b32.xlu1 %v2459_v4, %s2240_s21  ;;  %640 = vrot.lane.b32.xlu0 %v2466_v5, %s2240_s21 }
  0xcd   : > { %650 = vrot.lane.b32.xlu1 %v2473_v6, %s2240_s21  ;;  %648 = vrot.lane.b32.xlu0 %v2476_v7, %s2240_s21 }
  0xd1   : > { %692 = vrot.lane.b32.xlu1 %v2456_v3, %s2241_s19  ;;  %690 = vrot.lane.b32.xlu0 %v2446_v1, %s2241_s19 }
  0xd5   : > { %700 = vrot.lane.b32.xlu1 %v2453_v2, %s2241_s19  ;;  %698 = vrot.lane.b32.xlu0 %v2443_v0, %s2241_s19 }
  0xd9   : > { %696 = vrot.lane.b32.xlu1 %v2459_v4, %s2241_s19  ;;  %694 = vrot.lane.b32.xlu0 %v2466_v5, %s2241_s19 }
  0xdd   : > { %704 = vrot.lane.b32.xlu1 %v2473_v6, %s2241_s19  ;;  %702 = vrot.lane.b32.xlu0 %v2476_v7, %s2241_s19 }
  0xe1   : > { %746 = vrot.lane.b32.xlu1 %v2456_v3, %s2242_s22  ;;  %744 = vrot.lane.b32.xlu0 %v2446_v1, %s2242_s22 }
  0xe3   : > { %v366_v15 = vpop.permute.xlu1 %365  ;;  %v358_v16 = vpop.permute.xlu0 %357 }
  0xe4   : > { %v376_v18 = vsel %vm375_vm0, %v358_v16, %v366_v15  ;;  %v380_v20 = vsel %vm375_vm0, %v366_v15, %v358_v16 }
  0xe5   : > { %754 = vrot.lane.b32.xlu1 %v2453_v2, %s2242_s22  ;;  %752 = vrot.lane.b32.xlu0 %v2443_v0, %s2242_s22  ;;  %v397_v26 = vmul.f32 %v393_v17, %v376_v18  ;;  %v396_v28 = vmul.f32 %v389_v19, %v380_v20 }
  0xe7   : > { %v368_v21 = vpop.permute.xlu1 %367  ;;  %v360_v22 = vpop.permute.xlu0 %359 }
  0xe8   : > { %v381_v24 = vsel %vm375_vm0, %v368_v21, %v360_v22  ;;  %v377_v25 = vsel %vm375_vm0, %v360_v22, %v368_v21 }
  0xe9   : > { %750 = vrot.lane.b32.xlu1 %v2459_v4, %s2242_s22  ;;  %748 = vrot.lane.b32.xlu0 %v2466_v5, %s2242_s22  ;;  %v399_v27 = vmul.f32 %v393_v17, %v377_v25  ;;  %v398_v29 = vmul.f32 %v389_v19, %v381_v24 }
  0xeb   : > { %v364_v30 = vpop.permute.xlu1 %363  ;;  %v362_v31 = vpop.permute.xlu0 %361  ;;  %v405_v32 = vpack.c.bf16 %v399_v27, %v397_v26  ;;  %v404_v33 = vpack.c.bf16 %v398_v29, %v396_v28  ;;  %v492_v27 = vld [vmem:[#allocation3 + $0x2] ss:$8 sm:$0x3] }
  0xed   : > { %758 = vrot.lane.b32.xlu1 %v2473_v6, %s2242_s22  ;;  %756 = vrot.lane.b32.xlu0 %v2476_v7, %s2242_s22 }
  0xee   : > { %903 = vmatprep.subr.bf16.mxu0 %v405_v32  ;;  %v497_v32 = vrot.slane %v492_v27, %v2586_v13 }
  0xef   : > { %904 = vmatpush1.bf16.msra.mxu0 %v404_v33  ;;  %v372_v34 = vpop.permute.xlu1 %371  ;;  %v370_v35 = vpop.permute.xlu0 %369  ;;  %v501_v33 = vrot.slane %v492_v27, %v2580_v12 }
  0xf0   : > { %v379_v36 = vsel %vm375_vm0, %v364_v30, %v372_v34  ;;  %v383_v37 = vsel %vm375_vm0, %v372_v34, %v364_v30  ;;  %v378_v38 = vsel %vm375_vm0, %v362_v31, %v370_v35  ;;  %v382_v39 = vsel %vm375_vm0, %v370_v35, %v362_v31 }
  0xf1   : > { %v402_v40 = vmul.f32 %v389_v19, %v383_v37  ;;  %v403_v41 = vmul.f32 %v393_v17, %v379_v36  ;;  %v400_v42 = vmul.f32 %v389_v19, %v382_v39  ;;  %v401_v43 = vmul.f32 %v393_v17, %v378_v38  ;;  %853 = vperm.xlu1 %2039, %v843_v44  }
  0xf2   : > { %848 = vperm.xlu0 %2038, %v842_v45  }
  0xf3   : > { %v415_v47 = vpop.permute.xlu1 %414  ;;  %v413_v48 = vpop.permute.xlu0 %412  ;;  %v407_v49 = vpack.c.bf16 %v403_v41, %v401_v43  ;;  %v406_v50 = vpack.c.bf16 %v402_v40, %v400_v42 }
  0xf5   : > { %905 = vmatprep.subr.bf16.mxu0 %v407_v49  ;;  %858 = vperm.xlu1 %2039, %v844_v51  }
  0xf6   : > { %906 = vmatpush1.bf16.msra.mxu0 %v406_v50  ;;  %863 = vperm.xlu0 %2038, %v845_v52  }
  0xf7   : > { %v423_v55 = vpop.permute.xlu1 %422  ;;  %v421_v56 = vpop.permute.xlu0 %420 }
  0xf8   : > { %v430_v57 = vsel %vm428_vm1, %v415_v47, %v423_v55  ;;  %v434_v58 = vsel %vm428_vm1, %v423_v55, %v415_v47  ;;  %v429_v59 = vsel %vm428_vm1, %v413_v48, %v421_v56  ;;  %v433_v60 = vsel %vm428_vm1, %v421_v56, %v413_v48 }
  0xf9   : > { %v452_v61 = vmul.f32 %v443_v53, %v434_v58  ;;  %v453_v62 = vmul.f32 %v447_v54, %v430_v57  ;;  %v450_v63 = vmul.f32 %v443_v53, %v433_v60  ;;  %v451_v8 = vmul.f32 %v447_v54, %v429_v59  ;;  %v546_v58 = vld [vmem:[#allocation3 + $0x3] ss:$8 sm:$0x3] }
  0xfb   : > { %v419_v9 = vpop.permute.xlu1 %418  ;;  %v417_v10 = vpop.permute.xlu0 %416  ;;  %v459_v14 = vpack.c.bf16 %v453_v62, %v451_v8  ;;  %v458_v15 = vpack.c.bf16 %v452_v61, %v450_v63  ;;  %v551_v63 = vrot.slane %v546_v58, %v2586_v13  ;;  %v555_v8 = vrot.slane %v546_v58, %v2580_v12 }
  0xfd   : > { %907 = vmatprep.subr.bf16.mxu0 %v459_v14 }
  0xfe   : > { %908 = vmatpush1.bf16.msra.mxu0 %v458_v15 }
  0xff   : > { %v427_v16 = vpop.permute.xlu1 %426  ;;  %v425_v17 = vpop.permute.xlu0 %424 }
 0x100   : > { %v432_v18 = vsel %vm428_vm1, %v419_v9, %v427_v16  ;;  %v436_v19 = vsel %vm428_vm1, %v427_v16, %v419_v9  ;;  %v431_v20 = vsel %vm428_vm1, %v417_v10, %v425_v17  ;;  %v435_v21 = vsel %vm428_vm1, %v425_v17, %v417_v10 }
 0x101   : > { %v456_v22 = vmul.f32 %v443_v53, %v436_v19  ;;  %v457_v24 = vmul.f32 %v447_v54, %v432_v18  ;;  %v454_v25 = vmul.f32 %v443_v53, %v435_v21  ;;  %v455_v26 = vmul.f32 %v447_v54, %v431_v20 }
 0x103   : > { %v469_v28 = vpop.permute.xlu1 %468  ;;  %v467_v29 = vpop.permute.xlu0 %466  ;;  %v461_v30 = vpack.c.bf16 %v457_v24, %v455_v26  ;;  %v460_v31 = vpack.c.bf16 %v456_v22, %v454_v25 }
 0x105   : > { %909 = vmatprep.subr.bf16.mxu0 %v461_v30 }
 0x106   : > { %910 = vmatpush1.bf16.msra.mxu0 %v460_v31 }
 0x107   : > { %v477_v34 = vpop.permute.xlu1 %476  ;;  %v475_v35 = vpop.permute.xlu0 %474 }
 0x108   : > { %v484_v36 = vsel %vm482_vm2, %v469_v28, %v477_v34  ;;  %v488_v37 = vsel %vm482_vm2, %v477_v34, %v469_v28  ;;  %v483_v38 = vsel %vm482_vm2, %v467_v29, %v475_v35  ;;  %v487_v39 = vsel %vm482_vm2, %v475_v35, %v467_v29 }
 0x109   : > { %v506_v40 = vmul.f32 %v497_v32, %v488_v37  ;;  %v507_v41 = vmul.f32 %v501_v33, %v484_v36  ;;  %v504_v42 = vmul.f32 %v497_v32, %v487_v39  ;;  %v505_v43 = vmul.f32 %v501_v33, %v483_v38  ;;  %v608_v37 = vld [vmem:[#allocation3 + $0x5] ss:$8 sm:$0x3] }
 0x10b   : > { %v473_v44 = vpop.permute.xlu1 %472  ;;  %v471_v45 = vpop.permute.xlu0 %470  ;;  %v513_v46 = vpack.c.bf16 %v507_v41, %v505_v43  ;;  %v512_v47 = vpack.c.bf16 %v506_v40, %v504_v42  ;;  %v575_v42 = vpack.c.bf16 %v2453_v2, %v2443_v0  ;;  %v617_v43 = vrot.slane %v608_v37, %v2580_v12 }
 0x10d   : > { %911 = vmatprep.subr.bf16.mxu0 %v513_v46 }
 0x10e   : > { %912 = vmatpush1.bf16.msra.mxu0 %v512_v47 }
 0x10f   : > { %v481_v48 = vpop.permute.xlu1 %480  ;;  %v479_v49 = vpop.permute.xlu0 %478 }
 0x110   : > { %v486_v50 = vsel %vm482_vm2, %v473_v44, %v481_v48  ;;  %v490_v51 = vsel %vm482_vm2, %v481_v48, %v473_v44  ;;  %v485_v52 = vsel %vm482_vm2, %v471_v45, %v479_v49  ;;  %v489_v53 = vsel %vm482_vm2, %v479_v49, %v471_v45 }
 0x111   : > { %v510_v54 = vmul.f32 %v497_v32, %v490_v51  ;;  %v511_v55 = vmul.f32 %v501_v33, %v486_v50  ;;  %v508_v56 = vmul.f32 %v497_v32, %v489_v53  ;;  %v509_v57 = vmul.f32 %v501_v33, %v485_v52 }
 0x112   : > { %v574_v44 = vpack.c.bf16 %v2456_v3, %v2446_v1  ;;  %v613_v45 = vrot.slane %v608_v37, %v2586_v13  ;;  %v577_v48 = vpack.c.bf16 %v2473_v6, %v2476_v7  ;;  %v576_v51 = vpack.c.bf16 %v2459_v4, %v2466_v5 }
 0x113   : > { %v523_v59 = vpop.permute.xlu1 %522  ;;  %v521_v60 = vpop.permute.xlu0 %520  ;;  %v515_v61 = vpack.c.bf16 %v511_v55, %v509_v57  ;;  %v514_v62 = vpack.c.bf16 %v510_v54, %v508_v56 }
 0x115   : > { %913 = vmatprep.subr.bf16.mxu0 %v515_v61 }
 0x116   : > { %914 = vmatpush1.bf16.msra.mxu0 %v514_v62 }
 0x117   : > { %v531_v9 = vpop.permute.xlu1 %530  ;;  %v529_v10 = vpop.permute.xlu0 %528 }
 0x118   : > { %v538_v14 = vsel %vm536_vm3, %v523_v59, %v531_v9  ;;  %v542_v15 = vsel %vm536_vm3, %v531_v9, %v523_v59  ;;  %v537_v16 = vsel %vm536_vm3, %v521_v60, %v529_v10  ;;  %v541_v17 = vsel %vm536_vm3, %v529_v10, %v521_v60 }
 0x119   : > { %v560_v18 = vmul.f32 %v551_v63, %v542_v15  ;;  %v561_v19 = vmul.f32 %v555_v8, %v538_v14  ;;  %v558_v20 = vmul.f32 %v551_v63, %v541_v17  ;;  %v559_v21 = vmul.f32 %v555_v8, %v537_v16 }
 0x11b   : > { %v527_v22 = vpop.permute.xlu1 %526  ;;  %v525_v24 = vpop.permute.xlu0 %524  ;;  %v567_v25 = vpack.c.bf16 %v561_v19, %v559_v21  ;;  %v566_v26 = vpack.c.bf16 %v560_v18, %v558_v20 }
 0x11d   : > { %915 = vmatprep.subr.bf16.mxu0 %v567_v25 }
 0x11e   : > { %916 = vmatpush1.bf16.msra.mxu0 %v566_v26 }
 0x11f   : > { %v535_v27 = vpop.permute.xlu1 %534  ;;  %v533_v28 = vpop.permute.xlu0 %532 }
 0x120   : > { %v540_v29 = vsel %vm536_vm3, %v527_v22, %v535_v27  ;;  %v544_v30 = vsel %vm536_vm3, %v535_v27, %v527_v22  ;;  %v539_v31 = vsel %vm536_vm3, %v525_v24, %v533_v28  ;;  %v543_v32 = vsel %vm536_vm3, %v533_v28, %v525_v24 }
 0x121   : > { %v564_v33 = vmul.f32 %v551_v63, %v544_v30  ;;  %v565_v34 = vmul.f32 %v555_v8, %v540_v29  ;;  %v562_v35 = vmul.f32 %v551_v63, %v543_v32  ;;  %v563_v36 = vmul.f32 %v555_v8, %v539_v31  ;;  %v662_v8 = vld [vmem:[#allocation3 + $0x6] ss:$8 sm:$0x3] }
 0x122   : > { %v667_v16 = vrot.slane %v662_v8, %v2586_v13  ;;  %v671_v17 = vrot.slane %v662_v8, %v2580_v12 }
 0x123   : > { %v585_v38 = vpop.permute.xlu1 %584  ;;  %v583_v39 = vpop.permute.xlu0 %582  ;;  %v569_v40 = vpack.c.bf16 %v565_v34, %v563_v36  ;;  %v568_v41 = vpack.c.bf16 %v564_v33, %v562_v35 }
 0x125   : > { %917 = vmatprep.subr.bf16.mxu0 %v569_v40 }
 0x126   : > { %918 = vmatpush1.bf16.msra.mxu0 %v568_v41 }
 0x127   : > { %v593_v46 = vpop.permute.xlu1 %592  ;;  %v591_v47 = vpop.permute.xlu0 %590  ;;  %919 = vmatprep.subr.bf16.mxu0 %v575_v42 }
 0x128   : > { %v600_v0 = vsel %vm598_vm4, %v585_v38, %v593_v46  ;;  %v604_v2 = vsel %vm598_vm4, %v593_v46, %v585_v38  ;;  %v599_v49 = vsel %vm598_vm4, %v583_v39, %v591_v47  ;;  %v603_v1 = vsel %vm598_vm4, %v591_v47, %v583_v39 }
 0x129   : > { %v623_v3 = vmul.f32 %v617_v43, %v604_v2  ;;  %v621_v50 = vmul.f32 %v617_v43, %v603_v1  ;;  %v622_v52 = vmul.f32 %v613_v45, %v600_v0  ;;  %v620_v6 = vmul.f32 %v613_v45, %v599_v49 }
 0x12a   : > { %920 = vmatpush1.bf16.msra.mxu0 %v574_v44 }
 0x12b   : > { %v589_v7 = vpop.permute.xlu1 %588  ;;  %v587_v53 = vpop.permute.xlu0 %586  ;;  %921 = vmatprep.subr.bf16.mxu0 %v577_v48  ;;  %v629_v54 = vpack.c.bf16 %v623_v3, %v621_v50  ;;  %v628_v57 = vpack.c.bf16 %v622_v52, %v620_v6 }
 0x12e   : > { %922 = vmatpush1.bf16.msra.mxu0 %v576_v51 }
 0x12f   : > { %v597_v55 = vpop.permute.xlu1 %596  ;;  %v595_v56 = vpop.permute.xlu0 %594  ;;  %923 = vmatprep.subr.bf16.mxu0 %v629_v54 }
 0x130   : > { %v602_v58 = vsel %vm598_vm4, %v589_v7, %v597_v55  ;;  %v606_v59 = vsel %vm598_vm4, %v597_v55, %v589_v7  ;;  %v601_v4 = vsel %vm598_vm4, %v587_v53, %v595_v56  ;;  %v605_v5 = vsel %vm598_vm4, %v595_v56, %v587_v53 }
 0x131   : > { %v626_v60 = vmul.f32 %v613_v45, %v602_v58  ;;  %v627_v61 = vmul.f32 %v617_v43, %v606_v59  ;;  %v624_v62 = vmul.f32 %v613_v45, %v601_v4  ;;  %v625_v63 = vmul.f32 %v617_v43, %v605_v5  ;;  %v716_v43 = vld [vmem:[#allocation3 + $0x7] ss:$8 sm:$0x3] }
 0x132   : > { %924 = vmatpush1.bf16.msra.mxu0 %v628_v57  ;;  %v721_v48 = vrot.slane %v716_v43, %v2586_v13  ;;  %v725_v0 = vrot.slane %v716_v43, %v2580_v12 }
 0x133   : > { %v639_v9 = vpop.permute.xlu1 %638  ;;  %v637_v10 = vpop.permute.xlu0 %636  ;;  %v631_v14 = vpack.c.bf16 %v627_v61, %v625_v63  ;;  %v630_v15 = vpack.c.bf16 %v626_v60, %v624_v62 }
 0x135   : > { %925 = vmatprep.subr.bf16.mxu0 %v631_v14 }
 0x136   : > { %926 = vmatpush1.bf16.msra.mxu0 %v630_v15 }
 0x137   : > { %v647_v18 = vpop.permute.xlu1 %646  ;;  %v645_v19 = vpop.permute.xlu0 %644 }
 0x138   : > { %v654_v20 = vsel %vm652_vm5, %v639_v9, %v647_v18  ;;  %v658_v21 = vsel %vm652_vm5, %v647_v18, %v639_v9  ;;  %v653_v22 = vsel %vm652_vm5, %v637_v10, %v645_v19  ;;  %v657_v24 = vsel %vm652_vm5, %v645_v19, %v637_v10  ;;  %v770_v10 = vld [vmem:[#allocation3 + $0x10] ss:$8 sm:$0x3] }
 0x139   : > { %v676_v25 = vmul.f32 %v667_v16, %v654_v20  ;;  %v677_v26 = vmul.f32 %v671_v17, %v658_v21  ;;  %v674_v27 = vmul.f32 %v667_v16, %v653_v22  ;;  %v675_v28 = vmul.f32 %v671_v17, %v657_v24  ;;  %v2040_v20 = vld [vmem:[#allocation6] ss:$12 sps:$4 sm:$0xff]   ;;  %v2043_v21 = vld [vmem:[#allocation6 + $0x1c] ss:$12 sps:$4 sm:$0xff]  }
 0x13a   : > { %v775_v18 = vrot.slane %v770_v10, %v2586_v13  ;;  %v779_v19 = vrot.slane %v770_v10, %v2580_v12 }
 0x13b   : > { %v643_v29 = vpop.permute.xlu1 %642  ;;  %v641_v30 = vpop.permute.xlu0 %640  ;;  %v683_v31 = vpack.c.bf16 %v677_v26, %v675_v28  ;;  %v682_v32 = vpack.c.bf16 %v676_v25, %v674_v27 }
 0x13d   : > { %927 = vmatprep.subr.bf16.mxu0 %v683_v31 }
 0x13e   : > { %928 = vmatpush1.bf16.msra.mxu0 %v682_v32 }
 0x13f   : > { %v651_v33 = vpop.permute.xlu1 %650  ;;  %v649_v34 = vpop.permute.xlu0 %648 }
 0x140   : > { %v656_v35 = vsel %vm652_vm5, %v643_v29, %v651_v33  ;;  %v660_v36 = vsel %vm652_vm5, %v651_v33, %v643_v29  ;;  %v655_v37 = vsel %vm652_vm5, %v641_v30, %v649_v34  ;;  %v659_v38 = vsel %vm652_vm5, %v649_v34, %v641_v30 }
 0x141   : > { %v680_v39 = vmul.f32 %v667_v16, %v656_v35  ;;  %v681_v40 = vmul.f32 %v671_v17, %v660_v36  ;;  %v678_v41 = vmul.f32 %v667_v16, %v655_v37  ;;  %v679_v42 = vmul.f32 %v671_v17, %v659_v38  ;;  %v2045_v37 = vld [vmem:[#allocation6 + $0x18] ss:$12 sps:$4 sm:$0xff]  }
 0x143   : > { %v693_v44 = vpop.permute.xlu1 %692  ;;  %v691_v45 = vpop.permute.xlu0 %690  ;;  %v685_v46 = vpack.c.bf16 %v681_v40, %v679_v42  ;;  %v684_v47 = vpack.c.bf16 %v680_v39, %v678_v41 }
 0x145   : > { %929 = vmatprep.subr.bf16.mxu0 %v685_v46 }
 0x146   : > { %930 = vmatpush1.bf16.msra.mxu0 %v684_v47 }
 0x147   : > { %v701_v2 = vpop.permute.xlu1 %700  ;;  %v699_v49 = vpop.permute.xlu0 %698 }
 0x148   : > { %v708_v1 = vsel %vm706_vm6, %v693_v44, %v701_v2  ;;  %v712_v3 = vsel %vm706_vm6, %v701_v2, %v693_v44  ;;  %v707_v50 = vsel %vm706_vm6, %v691_v45, %v699_v49  ;;  %v711_v51 = vsel %vm706_vm6, %v699_v49, %v691_v45  ;;  %v2046_v2 = vld [vmem:[#allocation6 + $0x8] ss:$12 sps:$4 sm:$0xff]   ;;  %v2047_v49 = vld [vmem:[#allocation6 + $0x20] ss:$12 sps:$4 sm:$0xff]  }
 0x149   : > { %v730_v52 = vmul.f32 %v721_v48, %v708_v1  ;;  %v731_v6 = vmul.f32 %v725_v0, %v712_v3  ;;  %v728_v7 = vmul.f32 %v721_v48, %v707_v50  ;;  %v729_v53 = vmul.f32 %v725_v0, %v711_v51 }
 0x14b   : > { %v697_v54 = vpop.permute.xlu1 %696  ;;  %v695_v55 = vpop.permute.xlu0 %694  ;;  %v737_v56 = vpack.c.bf16 %v731_v6, %v729_v53  ;;  %v736_v57 = vpack.c.bf16 %v730_v52, %v728_v7 }
 0x14d   : > { %931 = vmatprep.subr.bf16.mxu0 %v737_v56 }
 0x14e   : > { %932 = vmatpush1.bf16.msra.mxu0 %v736_v57 }
 0x14f   : > { %v705_v58 = vpop.permute.xlu1 %704  ;;  %v703_v59 = vpop.permute.xlu0 %702 }
 0x150   : > { %v710_v4 = vsel %vm706_vm6, %v697_v54, %v705_v58  ;;  %v714_v5 = vsel %vm706_vm6, %v705_v58, %v697_v54  ;;  %v709_v60 = vsel %vm706_vm6, %v695_v55, %v703_v59  ;;  %v713_v61 = vsel %vm706_vm6, %v703_v59, %v695_v55 }
 0x151   : > { %v734_v62 = vmul.f32 %v721_v48, %v710_v4  ;;  %v735_v63 = vmul.f32 %v725_v0, %v714_v5  ;;  %v732_v8 = vmul.f32 %v721_v48, %v709_v60  ;;  %v733_v9 = vmul.f32 %v725_v0, %v713_v61 }
 0x153   : > { %v747_v14 = vpop.permute.xlu1 %746  ;;  %v745_v15 = vpop.permute.xlu0 %744  ;;  %v739_v16 = vpack.c.bf16 %v735_v63, %v733_v9  ;;  %v738_v17 = vpack.c.bf16 %v734_v62, %v732_v8 }
 0x155   : > { %933 = vmatprep.subr.bf16.mxu0 %v739_v16 }
 0x156   : > { %934 = vmatpush1.bf16.msra.mxu0 %v738_v17 }
 0x157   : > { %v755_v22 = vpop.permute.xlu1 %754  ;;  %v753_v24 = vpop.permute.xlu0 %752 }
 0x158   : > { %v762_v25 = vsel %vm760_vm7, %v747_v14, %v755_v22  ;;  %v766_v26 = vsel %vm760_vm7, %v755_v22, %v747_v14  ;;  %v761_v27 = vsel %vm760_vm7, %v745_v15, %v753_v24  ;;  %v765_v28 = vsel %vm760_vm7, %v753_v24, %v745_v15 }
 0x159   : > { %v784_v29 = vmul.f32 %v775_v18, %v762_v25  ;;  %v785_v30 = vmul.f32 %v779_v19, %v766_v26  ;;  %v782_v31 = vmul.f32 %v775_v18, %v761_v27  ;;  %v783_v32 = vmul.f32 %v779_v19, %v765_v28  ;;  %936 = vmatmul.mubr.bf16.vlgmr.msra.gmra.mrb[0].mxu0 %v2040_v20  ;;  %v1485_v27 = vld [vmem:[%s3312_s5] sm:$0xff] }
 0x15a   : > { %945 = vmatprep.mubr.bf16.mxu0 %v2043_v21 }
 0x15b   : > { %v790_v33 = vpack.c.bf16 %v784_v29, %v782_v31  ;;  %v751_v34 = vpop.permute.xlu1 %750  ;;  %v749_v35 = vpop.permute.xlu0 %748  ;;  %v791_v36 = vpack.c.bf16 %v785_v30, %v783_v32  ;;  %v1486_v29 = vld [vmem:[%s3312_s5 + $0x8] sm:$0xff]  ;;  %v1487_v31 = vld [vmem:[%s3312_s5 + $0x10] sm:$0xff] }
 0x15d   : > { %956 = vmatprep.subr.bf16.mxu0 %v791_v36 }
 0x15e   : > { %957 = vmatpush1.bf16.msra.mxu0 %v790_v33  ;;  %v1488_v33 = vld [vmem:[%s3312_s5 + $0x18] sm:$0xff] }
 0x15f   : > { %v759_v38 = vpop.permute.xlu1 %758  ;;  %v757_v39 = vpop.permute.xlu0 %756 }
 0x160   : > { %v764_v40 = vsel %vm760_vm7, %v751_v34, %v759_v38  ;;  %v768_v41 = vsel %vm760_vm7, %v759_v38, %v751_v34  ;;  %v763_v42 = vsel %vm760_vm7, %v749_v35, %v757_v39  ;;  %v767_v43 = vsel %vm760_vm7, %v757_v39, %v749_v35  ;;  %v1041_v34 = vld [vmem:[#allocation3] ss:$8 sm:$0x3] }
 0x161   : > { %v788_v44 = vmul.f32 %v775_v18, %v764_v40  ;;  %v789_v45 = vmul.f32 %v779_v19, %v768_v41  ;;  %v786_v46 = vmul.f32 %v775_v18, %v763_v42  ;;  %v787_v47 = vmul.f32 %v779_v19, %v767_v43  ;;  %946 = vmatmul.mubr.bf16.gmra.mrb[4].mxu0 %v2045_v37  ;;  %v2050_v19 = vld [vmem:[#allocation8 + $0x4] ss:$12 sps:$4 sm:$0xff]  }
 0x162   : > { %988 = vmatprep.mubr.bf16.mxu0 %v2243_v23  ;;  %1577 = vmatprep.mubr.bf16.mxu1 %v2050_v19  ;;  %v1046_v36 = vrot.slane %v1041_v34, %v2586_v13  ;;  %v1050_v38 = vrot.slane %v1041_v34, %v2580_v12 }
 0x163   : > { %v792_v48 = vpack.c.bf16 %v788_v44, %v786_v46  ;;  %v793_v0 = vpack.c.bf16 %v789_v45, %v787_v47 }
 0x165   : > { %958 = vmatprep.subr.bf16.mxu0 %v793_v0 }
 0x166   : > { %959 = vmatpush1.bf16.msra.mxu0 %v792_v48 }
 0x169   : > { %1901 = vmatmul.mubr.msk.bf16.vlgmr.msra.gmra.mrb[0].mxu0 %vm896_vm8, %v2046_v2 }
 0x16a   : > { %998 = vmatprep.mubr.bf16.mxu0 %v2243_v23 }
 0x170   : > { %v854_v52 = vpop.permute.xlu1 %853 }
 0x171   : > { %1902 = vmatmul.mubr.msk.bf16.gmra.mrb[4].mxu0 %vm896_vm8, %v2047_v49  ;;  %v849_v1 = vpop.permute.xlu0 %848 }
 0x174   : > { %v859_v62 = vpop.permute.xlu1 %858 }
 0x175   : > { %v864_v8 = vpop.permute.xlu0 %863 }
 0x23c   : > { %v990_v3 = vpop.f32.mrb[0].mxu0 }
 0x23d   : > { %v1922_v50 = vadd.f32 %v990_v3, %v849_v1  ;;  %v992_v51 = vpop.f32.mrb[1].mxu0 }
 0x23e   : > { %v994_v6 = vpop.f32.mrb[2].mxu0  ;;  %v1923_v4 = vadd.f32 %v992_v51, %v849_v1 }
 0x23f   : > { %v2778_v7 = vmax.f32 %v1922_v50, 0.0  ;;  %v1924_v53 = vadd.f32 %v994_v6, %v854_v52  ;;  %v996_v54 = vpop.f32.mrb[3].mxu0 }
 0x240   : > { %v1925_v5 = vadd.f32 %v996_v54, %v854_v52  ;;  %v2800_v60 = vmax.f32 %v1923_v4, 0.0 }
 0x241   : > { %v2780_v55 = vmax.f32 %v1924_v53, 0.0  ;;  %1017 = vrot.lane.b32.xlu1 %v2778_v7, %s2235_s25 }
 0x242   : > { %v2804_v61 = vmax.f32 %v1925_v5, 0.0  ;;  %v1257_v5 = vld [vmem:[#allocation3 + $0x5] ss:$8 sm:$0x3] }
 0x243   : > { %1019 = vrot.lane.b32.xlu0 %v2780_v55, %s2235_s25 }
 0x244   : > { %v1000_v56 = vpop.f32.mrb[4].mxu0 }
 0x245   : > { %v1002_v57 = vpop.f32.mrb[5].mxu0  ;;  %1069 = vrot.lane.b32.xlu1 %v2778_v7, %s2236_s26  ;;  %v1926_v63 = vadd.f32 %v1000_v56, %v859_v62 }
 0x246   : > { %v1004_v58 = vpop.f32.mrb[6].mxu0  ;;  %v1927_v15 = vadd.f32 %v1002_v57, %v859_v62 }
 0x247   : > { %v1006_v59 = vpop.f32.mrb[7].mxu0  ;;  %1071 = vrot.lane.b32.xlu0 %v2780_v55, %s2236_s26  ;;  %v1928_v9 = vadd.f32 %v1004_v58, %v864_v8  ;;  %v2820_v10 = vmax.f32 %v1926_v63, 0.0 }
 0x248   : > { %v1929_v16 = vadd.f32 %v1006_v59, %v864_v8  ;;  %v2840_v17 = vmax.f32 %v1927_v15, 0.0  ;;  %v1093_v59 = vld [vmem:[#allocation3 + $0x1] ss:$8 sm:$0x3] }
 0x249   : > { %1121 = vrot.lane.b32.xlu1 %v2778_v7, %s2237_s10  ;;  %v2824_v14 = vmax.f32 %v1928_v9, 0.0  ;;  %v1098_v8 = vrot.slane %v1093_v59, %v2586_v13  ;;  %v1102_v9 = vrot.slane %v1093_v59, %v2580_v12 }
 0x24a   : > { %v2844_v18 = vmax.f32 %v1929_v16, 0.0 }
 0x24b   : > { %1123 = vrot.lane.b32.xlu0 %v2780_v55, %s2237_s10 }
 0x24d   : > { %1173 = vrot.lane.b32.xlu1 %v2778_v7, %s2238_s13 }
 0x24f   : > { %1175 = vrot.lane.b32.xlu0 %v2780_v55, %s2238_s13 }
 0x251   : > { %1233 = vrot.lane.b32.xlu1 %v2778_v7, %s2239_s18 }
 0x253   : > { %1235 = vrot.lane.b32.xlu0 %v2780_v55, %s2239_s18 }
 0x255   : > { %1025 = vrot.lane.b32.xlu1 %v2800_v60, %s2235_s25 }
 0x257   : > { %1027 = vrot.lane.b32.xlu0 %v2804_v61, %s2235_s25 }
 0x259   : > { %1077 = vrot.lane.b32.xlu1 %v2800_v60, %s2236_s26 }
 0x25b   : > { %1079 = vrot.lane.b32.xlu0 %v2804_v61, %s2236_s26 }
 0x25d   : > { %1129 = vrot.lane.b32.xlu1 %v2800_v60, %s2237_s10 }
 0x25f   : > { %1131 = vrot.lane.b32.xlu0 %v2804_v61, %s2237_s10 }
 0x261   : > { %1181 = vrot.lane.b32.xlu1 %v2800_v60, %s2238_s13 }
 0x263   : > { %1183 = vrot.lane.b32.xlu0 %v2804_v61, %s2238_s13 }
 0x265   : > { %1021 = vrot.lane.b32.xlu1 %v2820_v10, %s2235_s25 }
 0x267   : > { %1023 = vrot.lane.b32.xlu0 %v2824_v14, %s2235_s25 }
 0x269   : > { %1073 = vrot.lane.b32.xlu1 %v2820_v10, %s2236_s26 }
 0x26b   : > { %1075 = vrot.lane.b32.xlu0 %v2824_v14, %s2236_s26 }
 0x26d   : > { %1125 = vrot.lane.b32.xlu1 %v2820_v10, %s2237_s10 }
 0x26f   : > { %1127 = vrot.lane.b32.xlu0 %v2824_v14, %s2237_s10 }
 0x271   : > { %1177 = vrot.lane.b32.xlu1 %v2820_v10, %s2238_s13 }
 0x273   : > { %1179 = vrot.lane.b32.xlu0 %v2824_v14, %s2238_s13 }
 0x275   : > { %1029 = vrot.lane.b32.xlu1 %v2840_v17, %s2235_s25 }
 0x277   : > { %1031 = vrot.lane.b32.xlu0 %v2844_v18, %s2235_s25  ;;  %s3259_s25 = scalar_lea.hbm %s3315_s8, %s1921_s20 }
 0x279   : > { %1241 = vrot.lane.b32.xlu1 %v2800_v60, %s2239_s18 }
 0x27b   : > { %1243 = vrot.lane.b32.xlu0 %v2804_v61, %s2239_s18 }
 0x27d   : > { %1081 = vrot.lane.b32.xlu1 %v2840_v17, %s2236_s26 }
 0x27f   : > { %1083 = vrot.lane.b32.xlu0 %v2844_v18, %s2236_s26 }
 0x281   : > { %1133 = vrot.lane.b32.xlu1 %v2840_v17, %s2237_s10 }
 0x283   : > { %1239 = vrot.lane.b32.xlu0 %v2824_v14, %s2239_s18 }
 0x285   : > { %1185 = vrot.lane.b32.xlu1 %v2840_v17, %s2238_s13 }
 0x287   : > { %1135 = vrot.lane.b32.xlu0 %v2844_v18, %s2237_s10  ;;  %s2156_s10 = scalar_lea.vmem %s3261_s29, 1024 }
 0x288   : > { %p2157_p12 = scmp.ne.s32.totalorder %s3261_s29, %s2156_s10 }
 0x289   : > { %1237 = vrot.lane.b32.xlu1 %v2820_v10, %s2239_s18 }
 0x28a   : > { %p2158_p2 = pnand %p2157_p12, %p3341_p1 }
 0x28b   : > { %1287 = vrot.lane.b32.xlu0 %v2780_v55, %s2240_s21 }
 0x28c   : > { %p2159_p3 = pneg %p2158_p2 }
 0x28d   : > { %1245 = vrot.lane.b32.xlu1 %v2840_v17, %s2239_s18 }
 0x28f   : > { %1187 = vrot.lane.b32.xlu0 %v2844_v18, %s2238_s13  ;;  %s2244_s13 = smov [#allocation9]  }
 0x291   : > { %1285 = vrot.lane.b32.xlu1 %v2778_v7, %s2240_s21 }
 0x293   : > { %1295 = vrot.lane.b32.xlu0 %v2804_v61, %s2240_s21 }
 0x295   : > { %1293 = vrot.lane.b32.xlu1 %v2800_v60, %s2240_s21 }
 0x297   : > { %1291 = vrot.lane.b32.xlu0 %v2824_v14, %s2240_s21 }
 0x299   : > { %1289 = vrot.lane.b32.xlu1 %v2820_v10, %s2240_s21 }
 0x29b   : > { %1339 = vrot.lane.b32.xlu0 %v2780_v55, %s2241_s19 }
 0x29d   : > { %1297 = vrot.lane.b32.xlu1 %v2840_v17, %s2240_s21 }
 0x29f   : > { %1247 = vrot.lane.b32.xlu0 %v2844_v18, %s2239_s18  ;;  %s2160_s18 = sshll.u32 %s2244_s13, 4  ;;  %s2161_s18 = int_to_ptr.vmem [resolvable:$false] %s2160_s18 }
 0x2a0   : > { %p2163_p4 = scmp.lt.s32.totalorder %s3261_s29, %s2161_s18 }
 0x2a1   : > { %1337 = vrot.lane.b32.xlu1 %v2778_v7, %s2241_s19 }
 0x2a3   : > { %1347 = vrot.lane.b32.xlu0 %v2804_v61, %s2241_s19 }
 0x2a5   : > { %1345 = vrot.lane.b32.xlu1 %v2800_v60, %s2241_s19 }
 0x2a7   : > { %1299 = vrot.lane.b32.xlu0 %v2844_v18, %s2240_s21  ;;  %s2162_s21 = scalar_lea.vmem %s2161_s18, 2048 }
 0x2a8   : > { %p2164_p7 = scmp.lt.s32.totalorder %s2162_s21, %s2156_s10 }
 0x2a9   : > { %1341 = vrot.lane.b32.xlu1 %v2820_v10, %s2241_s19 }
 0x2aa   : > { %p2165_p8 = por %p2164_p7, %p2163_p4 }
 0x2ab   : > { %1343 = vrot.lane.b32.xlu0 %v2824_v14, %s2241_s19 }
 0x2ac   : > { %p2166_p11 = pnand %p2165_p8, %p2159_p3 }
 0x2ad   : > { %1349 = vrot.lane.b32.xlu1 %v2840_v17, %s2241_s19 }
 0x2af   : > { %1351 = vrot.lane.b32.xlu0 %v2844_v18, %s2241_s19 }
 0x2b1   : > { %1389 = vrot.lane.b32.xlu1 %v2778_v7, %s2242_s22 }
 0x2b3   : > { %1391 = vrot.lane.b32.xlu0 %v2780_v55, %s2242_s22  ;;  %v1018_v20 = vpop.permute.xlu1 %1017 }
 0x2b5   : > { %v1020_v21 = vpop.permute.xlu0 %1019  ;;  %1397 = vrot.lane.b32.xlu1 %v2800_v60, %s2242_s22 }
 0x2b7   : > { %1399 = vrot.lane.b32.xlu0 %v2804_v61, %s2242_s22  ;;  %v1070_v22 = vpop.permute.xlu1 %1069 }
 0x2b9   : > { %v2914_v24 = vpop.permute.xlu0 %1071  ;;  %1393 = vrot.lane.b32.xlu1 %v2820_v10, %s2242_s22 }
 0x2bb   : > { %1395 = vrot.lane.b32.xlu0 %v2824_v14, %s2242_s22  ;;  %v2920_v25 = vpop.permute.xlu1 %1121 }
 0x2bd   : > { %v2922_v26 = vpop.permute.xlu0 %1123  ;;  %1401 = vrot.lane.b32.xlu1 %v2840_v17, %s2242_s22 }
 0x2bf   : > { %1403 = vrot.lane.b32.xlu0 %v2844_v18, %s2242_s22  ;;  %v2931_v28 = vpop.permute.xlu1 %1173 }
 0x2c1   : > { %v2936_v30 = vpop.permute.xlu0 %1175  ;;  %1491 = vperm.xlu1 %2039, %v1485_v27   ;;  %v2986_v27 = vrot.slane %v1257_v5, %v2586_v13 }
 0x2c3   : > { %1496 = vperm.xlu0 %2038, %v1486_v29   ;;  %v1234_v32 = vpop.permute.xlu1 %1233  ;;  %v2989_v29 = vrot.slane %v1257_v5, %v2580_v12 }
 0x2c5   : > { %v2944_v35 = vpop.permute.xlu0 %1235  ;;  %1501 = vperm.xlu1 %2039, %v1487_v31  }
 0x2c7   : > { %1506 = vperm.xlu0 %2038, %v1488_v33   ;;  %v1026_v37 = vpop.permute.xlu1 %1025 }
 0x2c8   : > { %v1033_v39 = vsel %vm375_vm0, %v1018_v20, %v1026_v37  ;;  %v1037_v40 = vsel %vm375_vm0, %v1026_v37, %v1018_v20 }
 0x2c9   : > { %v1028_v41 = vpop.permute.xlu0 %1027  ;;  %v1053_v44 = vmul.f32 %v1046_v36, %v1037_v40  ;;  %v1054_v47 = vmul.f32 %v1050_v38, %v1033_v39 }
 0x2ca   : > { %v1034_v42 = vsel %vm375_vm0, %v1020_v21, %v1028_v41  ;;  %v1038_v43 = vsel %vm375_vm0, %v1028_v41, %v1020_v21 }
 0x2cb   : > { %v1055_v45 = vmul.f32 %v1046_v36, %v1038_v43  ;;  %v1078_v46 = vpop.permute.xlu1 %1077  ;;  %v1056_v48 = vmul.f32 %v1050_v38, %v1034_v42 }
 0x2cc   : > { %v1085_v19 = vsel %vm428_vm1, %v1070_v22, %v1078_v46  ;;  %v1089_v20 = vsel %vm428_vm1, %v1078_v46, %v1070_v22 }
 0x2cd   : > { %v1080_v0 = vpop.permute.xlu0 %1079  ;;  %v1062_v2 = vpack.c.bf16 %v1056_v48, %v1054_v47  ;;  %v1061_v49 = vpack.c.bf16 %v1055_v45, %v1053_v44  ;;  %v1106_v43 = vmul.f32 %v1102_v9, %v1085_v19  ;;  %v1145_v47 = vld [vmem:[#allocation3 + $0x2] ss:$8 sm:$0x3] }
 0x2ce   : > { %v1086_v62 = vsel %vm428_vm1, %v2914_v24, %v1080_v0  ;;  %v1090_v31 = vsel %vm428_vm1, %v1080_v0, %v2914_v24  ;;  %v1105_v24 = vmul.f32 %v1098_v8, %v1089_v20 }
 0x2cf   : > { %1545 = vmatprep.subr.bf16.mxu1 %v1062_v2  ;;  %v2956_v1 = vpop.permute.xlu1 %1129  ;;  %v1108_v33 = vmul.f32 %v1102_v9, %v1086_v62  ;;  %v1107_v46 = vmul.f32 %v1098_v8, %v1090_v31 }
 0x2d0   : > { %1546 = vmatpush1.bf16.msra.mxu1 %v1061_v49  ;;  %v1137_v19 = vsel %vm482_vm2, %v2920_v25, %v2956_v1 }
 0x2d1   : > { %v2958_v3 = vpop.permute.xlu0 %1131 }
 0x2d3   : > { %v2960_v50 = vpop.permute.xlu1 %1181 }
 0x2d5   : > { %v2962_v51 = vpop.permute.xlu0 %1183 }
 0x2d7   : > { %v1022_v52 = vpop.permute.xlu1 %1021 }
 0x2d9   : > { %v1024_v6 = vpop.permute.xlu0 %1023 }
 0x2db   : > { %v1074_v53 = vpop.permute.xlu1 %1073 }
 0x2dd   : > { %v1076_v54 = vpop.permute.xlu0 %1075 }
 0x2df   : > { %v2964_v56 = vpop.permute.xlu1 %1125 }
 0x2e1   : > { %v2966_v57 = vpop.permute.xlu0 %1127 }
 0x2e3   : > { %v2968_v58 = vpop.permute.xlu1 %1177 }
 0x2e5   : > { %v2970_v4 = vpop.permute.xlu0 %1179 }
 0x2e7   : > { %v1030_v63 = vpop.permute.xlu1 %1029 }
 0x2e8   : > { %v1035_v15 = vsel %vm375_vm0, %v1022_v52, %v1030_v63  ;;  %v1039_v16 = vsel %vm375_vm0, %v1030_v63, %v1022_v52  ;;  %v1150_v63 = vrot.slane %v1145_v47, %v2586_v13 }
 0x2e9   : > { %v1032_v21 = vpop.permute.xlu0 %1031  ;;  %v1057_v39 = vmul.f32 %v1046_v36, %v1039_v16  ;;  %v1058_v22 = vmul.f32 %v1050_v38, %v1035_v15  ;;  %v1154_v15 = vrot.slane %v1145_v47, %v2580_v12 }
 0x2ea   : > { %v1036_v34 = vsel %vm375_vm0, %v1024_v6, %v1032_v21  ;;  %v1040_v37 = vsel %vm375_vm0, %v1032_v21, %v1024_v6  ;;  %v1113_v21 = vpack.c.bf16 %v1107_v46, %v1105_v24 }
 0x2eb   : > { %v1059_v40 = vmul.f32 %v1046_v36, %v1040_v37  ;;  %v1060_v41 = vmul.f32 %v1050_v38, %v1036_v34  ;;  %v1242_v42 = vpop.permute.xlu1 %1241  ;;  %v1138_v36 = vsel %vm482_vm2, %v2922_v26, %v2958_v3 }
 0x2ec   : > { %v1249_v44 = vsel %vm598_vm4, %v1234_v32, %v1242_v42  ;;  %v1253_v45 = vsel %vm598_vm4, %v1242_v42, %v1234_v32  ;;  %v1114_v32 = vpack.c.bf16 %v1108_v33, %v1106_v43  ;;  %v1160_v34 = vmul.f32 %v1154_v15, %v1138_v36 }
 0x2ed   : > { %v1244_v48 = vpop.permute.xlu0 %1243  ;;  %v1064_v0 = vpack.c.bf16 %v1060_v41, %v1058_v22  ;;  %v1063_v2 = vpack.c.bf16 %v1059_v40, %v1057_v39  ;;  %v3013_v52 = vmul.f32 %v2986_v27, %v1249_v44  ;;  %v3016_v6 = vmul.f32 %v2989_v29, %v1253_v45 }
 0x2ee   : > { %v1250_v38 = vsel %vm598_vm4, %v2944_v35, %v1244_v48  ;;  %v1254_v49 = vsel %vm598_vm4, %v1244_v48, %v2944_v35  ;;  %v1141_v44 = vsel %vm482_vm2, %v2956_v1, %v2920_v25  ;;  %v1158_v45 = vmul.f32 %v1154_v15, %v1137_v19 }
 0x2ef   : > { %v3019_v59 = vmul.f32 %v2986_v27, %v1250_v38  ;;  %v3022_v5 = vmul.f32 %v2989_v29, %v1254_v49  ;;  %1547 = vmatprep.subr.bf16.mxu1 %v1064_v0  ;;  %v1082_v62 = vpop.permute.xlu1 %1081  ;;  %v1157_v48 = vmul.f32 %v1150_v63, %v1141_v44  ;;  %v1194_v49 = vsel %vm536_vm3, %v2962_v51, %v2936_v30 }
 0x2f0   : > { %v1087_v35 = vsel %vm428_vm1, %v1074_v53, %v1082_v62  ;;  %v1091_v16 = vsel %vm428_vm1, %v1082_v62, %v1074_v53  ;;  %1548 = vmatpush1.bf16.msra.mxu1 %v1063_v2  ;;  %v1142_v53 = vsel %vm482_vm2, %v2958_v3, %v2922_v26  ;;  %v1197_v3 = vld [vmem:[#allocation3 + $0x3] ss:$8 sm:$0x3]  ;;  %v1189_v2 = vsel %vm536_vm3, %v2931_v28, %v2960_v50 }
 0x2f1   : > { %v1084_v20 = vpop.permute.xlu0 %1083  ;;  %1549 = vmatprep.subr.bf16.mxu1 %v1114_v32  ;;  %v1278_v31 = vpack.c.bf16 %v3022_v5, %v3016_v6  ;;  %v1277_v33 = vpack.c.bf16 %v3019_v59, %v3013_v52  ;;  %v1109_v22 = vmul.f32 %v1098_v8, %v1091_v16  ;;  %v1110_v40 = vmul.f32 %v1102_v9, %v1087_v35 }
 0x2f2   : > { %v1088_v37 = vsel %vm428_vm1, %v1076_v54, %v1084_v20  ;;  %v1092_v39 = vsel %vm428_vm1, %v1084_v20, %v1076_v54  ;;  %v1159_v26 = vmul.f32 %v1150_v63, %v1142_v53  ;;  %v1190_v54 = vsel %vm536_vm3, %v2936_v30, %v2962_v51 }
 0x2f3   : > { %v1111_v41 = vmul.f32 %v1098_v8, %v1092_v39  ;;  %v1112_v42 = vmul.f32 %v1102_v9, %v1088_v37  ;;  %v1134_v43 = vpop.permute.xlu1 %1133  ;;  %v1166_v9 = vpack.c.bf16 %v1160_v34, %v1158_v45  ;;  %v1206_v0 = vrot.slane %v1197_v3, %v2580_v12 }
 0x2f4   : > { %1550 = vmatpush1.bf16.msra.mxu1 %v1113_v21  ;;  %v1139_v25 = vsel %vm482_vm2, %v2964_v56, %v1134_v43  ;;  %v1143_v1 = vsel %vm482_vm2, %v1134_v43, %v2964_v56  ;;  %v1165_v38 = vpack.c.bf16 %v1159_v26, %v1157_v48  ;;  %v1202_v53 = vrot.slane %v1197_v3, %v2586_v13 }
 0x2f5   : > { %v3050_v24 = vpop.permute.xlu0 %1239  ;;  %v1116_v46 = vpack.c.bf16 %v1112_v42, %v1110_v40  ;;  %v1115_v47 = vpack.c.bf16 %v1111_v41, %v1109_v22  ;;  %v1212_v32 = vmul.f32 %v1206_v0, %v1190_v54  ;;  %v1161_v35 = vmul.f32 %v1150_v63, %v1143_v1 }
 0x2f6   : > { %v1162_v16 = vmul.f32 %v1154_v15, %v1139_v25  ;;  %v1193_v30 = vsel %vm536_vm3, %v2960_v50, %v2931_v28  ;;  %v1210_v51 = vmul.f32 %v1206_v0, %v1189_v2  ;;  %v1211_v22 = vmul.f32 %v1202_v53, %v1194_v49 }
 0x2f7   : > { %1551 = vmatprep.subr.bf16.mxu1 %v1116_v46  ;;  %v1186_v8 = vpop.permute.xlu1 %1185  ;;  %v1209_v41 = vmul.f32 %v1202_v53, %v1193_v30 }
 0x2f8   : > { %1552 = vmatpush1.bf16.msra.mxu1 %v1115_v47  ;;  %v1218_v40 = vpack.c.bf16 %v1212_v32, %v1210_v51  ;;  %v1361_v51 = vld [vmem:[#allocation3 + $0x7] ss:$8 sm:$0x3] }
 0x2f9   : > { %v1136_v36 = vpop.permute.xlu0 %1135  ;;  %1553 = vmatprep.subr.bf16.mxu1 %v1166_v9  ;;  %v1217_v43 = vpack.c.bf16 %v1211_v22, %v1209_v41 }
 0x2fa   : > { %v1140_v62 = vsel %vm482_vm2, %v2966_v57, %v1136_v36  ;;  %v1144_v56 = vsel %vm482_vm2, %v1136_v36, %v2966_v57  ;;  %v1309_v36 = vld [vmem:[#allocation3 + $0x6] ss:$8 sm:$0x3] }
 0x2fb   : > { %v1163_v19 = vmul.f32 %v1150_v63, %v1144_v56  ;;  %v1164_v20 = vmul.f32 %v1154_v15, %v1140_v62  ;;  %v1238_v21 = vpop.permute.xlu1 %1237  ;;  %v1191_v63 = vsel %vm536_vm3, %v2968_v58, %v1186_v8  ;;  %v1195_v15 = vsel %vm536_vm3, %v1186_v8, %v2968_v58 }
 0x2fc   : > { %1554 = vmatpush1.bf16.msra.mxu1 %v1165_v38  ;;  %v1213_v44 = vmul.f32 %v1202_v53, %v1195_v15  ;;  %v1214_v45 = vmul.f32 %v1206_v0, %v1191_v63  ;;  %v1226_v8 = vpack.c.bf16 %v2804_v61, %v2800_v60  ;;  %v1227_v60 = vpack.c.bf16 %v2824_v14, %v2820_v10 }
 0x2fd   : > { %v1288_v34 = vpop.permute.xlu0 %1287  ;;  %v1168_v37 = vpack.c.bf16 %v1164_v20, %v1162_v16  ;;  %v1167_v39 = vpack.c.bf16 %v1163_v19, %v1161_v35 }
 0x2ff   : > { %1555 = vmatprep.subr.bf16.mxu1 %v1168_v37  ;;  %v1246_v57 = vpop.permute.xlu1 %1245 }
 0x300   : > { %1556 = vmatpush1.bf16.msra.mxu1 %v1167_v39  ;;  %v1251_v2 = vsel %vm598_vm4, %v1238_v21, %v1246_v57  ;;  %v1255_v38 = vsel %vm598_vm4, %v1246_v57, %v1238_v21 }
 0x301   : > { %v1188_v42 = vpop.permute.xlu0 %1187  ;;  %1557 = vmatprep.subr.bf16.mxu1 %v1218_v40  ;;  %v1274_v56 = vmul.f32 %v2989_v29, %v1255_v38 }
 0x302   : > { %v1192_v28 = vsel %vm536_vm3, %v2970_v4, %v1188_v42  ;;  %v1196_v50 = vsel %vm536_vm3, %v1188_v42, %v2970_v4  ;;  %v1225_v4 = vpack.c.bf16 %v2780_v55, %v2778_v7  ;;  %v1273_v55 = vmul.f32 %v2986_v27, %v1251_v2 }
 0x303   : > { %v1215_v26 = vmul.f32 %v1202_v53, %v1196_v50  ;;  %v1216_v3 = vmul.f32 %v1206_v0, %v1192_v28  ;;  %v1286_v46 = vpop.permute.xlu1 %1285  ;;  %v1228_v0 = vpack.c.bf16 %v2844_v18, %v2840_v17  ;;  %v1314_v17 = vrot.slane %v1309_v36, %v2586_v13 }
 0x304   : > { %1558 = vmatpush1.bf16.msra.mxu1 %v1217_v43  ;;  %v1318_v18 = vrot.slane %v1309_v36, %v2580_v12 }
 0x305   : > { %v1296_v47 = vpop.permute.xlu0 %1295  ;;  %v1220_v58 = vpack.c.bf16 %v1216_v3, %v1214_v45  ;;  %v1219_v48 = vpack.c.bf16 %v1215_v26, %v1213_v44  ;;  %v1366_v44 = vrot.slane %v1361_v51, %v2586_v13 }
 0x306   : > { %v1306_v10 = vsel %vm652_vm5, %v1296_v47, %v1288_v34  ;;  %v1302_v16 = vsel %vm652_vm5, %v1288_v34, %v1296_v47 }
 0x307   : > { %1559 = vmatprep.subr.bf16.mxu1 %v1220_v58  ;;  %v1294_v54 = vpop.permute.xlu1 %1293  ;;  %v1324_v19 = vmul.f32 %v1318_v18, %v1306_v10 }
 0x308   : > { %1560 = vmatpush1.bf16.msra.mxu1 %v1219_v48  ;;  %v1305_v7 = vsel %vm652_vm5, %v1294_v54, %v1286_v46  ;;  %v1301_v14 = vsel %vm652_vm5, %v1286_v46, %v1294_v54 }
 0x309   : > { %v1292_v9 = vpop.permute.xlu0 %1291  ;;  %1561 = vmatprep.subr.bf16.mxu1 %v1226_v8  ;;  %v1322_v35 = vmul.f32 %v1318_v18, %v1305_v7  ;;  %v1321_v20 = vmul.f32 %v1314_v17, %v1301_v14 }
 0x30b   : > { %v1290_v25 = vpop.permute.xlu1 %1289  ;;  %v1330_v34 = vpack.c.bf16 %v1324_v19, %v1322_v35 }
 0x30c   : > { %1562 = vmatpush1.bf16.msra.mxu1 %v1225_v4 }
 0x30d   : > { %v1340_v1 = vpop.permute.xlu0 %1339  ;;  %1563 = vmatprep.subr.bf16.mxu1 %v1228_v0 }
 0x30f   : > { %v1298_v61 = vpop.permute.xlu1 %1297 }
 0x310   : > { %1564 = vmatpush1.bf16.msra.mxu1 %v1227_v60  ;;  %v1303_v30 = vsel %vm652_vm5, %v1290_v25, %v1298_v61 }
 0x311   : > { %v1248_v49 = vpop.permute.xlu0 %1247  ;;  %1565 = vmatprep.subr.bf16.mxu1 %v1278_v31  ;;  %v1325_v59 = vmul.f32 %v1314_v17, %v1303_v30 }
 0x312   : > { %v1252_v32 = vsel %vm598_vm4, %v3050_v24, %v1248_v49  ;;  %v1256_v62 = vsel %vm598_vm4, %v1248_v49, %v3050_v24 }
 0x313   : > { %v1275_v6 = vmul.f32 %v2986_v27, %v1252_v32  ;;  %v1276_v5 = vmul.f32 %v2989_v29, %v1256_v62  ;;  %v1338_v31 = vpop.permute.xlu1 %1337  ;;  %v1323_v27 = vmul.f32 %v1314_v17, %v1302_v16  ;;  %v1307_v29 = vsel %vm652_vm5, %v1298_v61, %v1290_v25  ;;  %v2048_v62 = vld [vmem:[#allocation8] ss:$12 sps:$4 sm:$0xff]  }
 0x314   : > { %1566 = vmatpush1.bf16.msra.mxu1 %v1277_v33  ;;  %v1370_v33 = vrot.slane %v1361_v51, %v2580_v12  ;;  %v1326_v57 = vmul.f32 %v1318_v18, %v1307_v29 }
 0x315   : > { %v1348_v21 = vpop.permute.xlu0 %1347  ;;  %v1280_v53 = vpack.c.bf16 %v1276_v5, %v1274_v56  ;;  %v1279_v24 = vpack.c.bf16 %v1275_v6, %v1273_v55  ;;  %v1329_v22 = vpack.c.bf16 %v1323_v27, %v1321_v20  ;;  %v1413_v55 = vld [vmem:[#allocation3 + $0x10] ss:$8 sm:$0x3]  ;;  %v2053_v27 = vld [vmem:[#allocation8 + $0x18] ss:$12 sps:$4 sm:$0xff]  }
 0x316   : > { %v1358_v40 = vsel %vm706_vm6, %v1348_v21, %v1340_v1  ;;  %v1354_v45 = vsel %vm706_vm6, %v1340_v1, %v1348_v21  ;;  %v1418_v10 = vrot.slane %v1413_v55, %v2586_v13  ;;  %v1422_v14 = vrot.slane %v1413_v55, %v2580_v12  ;;  %v2051_v6 = vld [vmem:[#allocation8 + $0x1c] ss:$12 sps:$4 sm:$0xff]  }
 0x317   : > { %v1346_v37 = vpop.permute.xlu1 %1345  ;;  %1567 = vmatprep.subr.bf16.mxu1 %v1280_v53  ;;  %v1376_v26 = vmul.f32 %v1370_v33, %v1358_v40  ;;  %v1375_v8 = vmul.f32 %v1366_v44, %v1354_v45 }
 0x318   : > { %v1357_v52 = vsel %vm706_vm6, %v1346_v37, %v1338_v31  ;;  %1568 = vmatpush1.bf16.msra.mxu1 %v1279_v24  ;;  %v1353_v15 = vsel %vm706_vm6, %v1338_v31, %v1346_v37 }
 0x319   : > { %v1300_v39 = vpop.permute.xlu0 %1299  ;;  %1569 = vmatprep.subr.bf16.mxu1 %v1330_v34  ;;  %v1374_v42 = vmul.f32 %v1370_v33, %v1357_v52  ;;  %v1373_v58 = vmul.f32 %v1366_v44, %v1353_v15  ;;  %v2055_v15 = vld [vmem:[#allocation8 + $0x20] ss:$12 sps:$4 sm:$0xff]  }
 0x31a   : > { %v1304_v41 = vsel %vm652_vm5, %v1292_v9, %v1300_v39  ;;  %v1308_v63 = vsel %vm652_vm5, %v1300_v39, %v1292_v9 }
 0x31b   : > { %v1327_v28 = vmul.f32 %v1314_v17, %v1304_v41  ;;  %v1328_v50 = vmul.f32 %v1318_v18, %v1308_v63  ;;  %v1342_v43 = vpop.permute.xlu1 %1341  ;;  %v1382_v54 = vpack.c.bf16 %v1376_v26, %v1374_v42  ;;  %v1381_v2 = vpack.c.bf16 %v1375_v8, %v1373_v58  ;;  %v2054_v63 = vld [vmem:[#allocation8 + $0x8] ss:$12 sps:$4 sm:$0xff]  }
 0x31c   : > { %1570 = vmatpush1.bf16.msra.mxu1 %v1329_v22 }
 0x31d   : > { %v1344_v3 = vpop.permute.xlu0 %1343  ;;  %v1332_v46 = vpack.c.bf16 %v1328_v50, %v1326_v57  ;;  %v1331_v47 = vpack.c.bf16 %v1327_v28, %v1325_v59 }
 0x31f   : > { %v1350_v48 = vpop.permute.xlu1 %1349  ;;  %1571 = vmatprep.subr.bf16.mxu1 %v1332_v46 }
 0x320   : > { %v1355_v9 = vsel %vm706_vm6, %v1342_v43, %v1350_v48  ;;  %v1359_v4 = vsel %vm706_vm6, %v1350_v48, %v1342_v43  ;;  %1572 = vmatpush1.bf16.msra.mxu1 %v1331_v47 }
 0x321   : > { %v1352_v25 = vpop.permute.xlu0 %1351  ;;  %1573 = vmatprep.subr.bf16.mxu1 %v1382_v54  ;;  %v1377_v36 = vmul.f32 %v1366_v44, %v1355_v9  ;;  %v1378_v60 = vmul.f32 %v1370_v33, %v1359_v4 }
 0x322   : > { %v1356_v0 = vsel %vm706_vm6, %v1344_v3, %v1352_v25  ;;  %v1360_v1 = vsel %vm706_vm6, %v1352_v25, %v1344_v3 }
 0x323   : > { %v1379_v61 = vmul.f32 %v1366_v44, %v1356_v0  ;;  %v1380_v38 = vmul.f32 %v1370_v33, %v1360_v1  ;;  %v1390_v7 = vpop.permute.xlu1 %1389 }
 0x324   : > { %1574 = vmatpush1.bf16.msra.mxu1 %v1381_v2 }
 0x325   : > { %v1392_v17 = vpop.permute.xlu0 %1391  ;;  %v1384_v18 = vpack.c.bf16 %v1380_v38, %v1378_v60  ;;  %v1383_v49 = vpack.c.bf16 %v1379_v61, %v1377_v36  ;;  %v1669_v38 = vld [vmem:[%s3313_s6 + $0x8] sm:$0xff] }
 0x327   : > { %v1398_v32 = vpop.permute.xlu1 %1397  ;;  %1575 = vmatprep.subr.bf16.mxu1 %v1384_v18  ;;  %v1668_v18 = vld [vmem:[%s3313_s6] sm:$0xff] }
 0x328   : > { %v1405_v56 = vsel %vm760_vm7, %v1390_v7, %v1398_v32  ;;  %v1409_v35 = vsel %vm760_vm7, %v1398_v32, %v1390_v7  ;;  %1576 = vmatpush1.bf16.msra.mxu1 %v1383_v49 }
 0x329   : > { %v1400_v5 = vpop.permute.xlu0 %1399  ;;  %v1425_v16 = vmul.f32 %v1418_v10, %v1405_v56  ;;  %v1426_v12 = vmul.f32 %v1422_v14, %v1409_v35  ;;  %v1671_v35 = vld [vmem:[%s3313_s6 + $0x18] sm:$0xff] }
 0x32a   : > { %v1406_v31 = vsel %vm760_vm7, %v1392_v17, %v1400_v5  ;;  %v1410_v13 = vsel %vm760_vm7, %v1400_v5, %v1392_v17 }
 0x32b   : > { %v1427_v19 = vmul.f32 %v1418_v10, %v1406_v31  ;;  %v1428_v20 = vmul.f32 %v1422_v14, %v1410_v13  ;;  %v1394_v21 = vpop.permute.xlu1 %1393  ;;  %1578 = vmatmul.mubr.bf16.vlgmr.msra.gmra.mrb[0].mxu1 %v2048_v62 }
 0x32c   : > { %1587 = vmatprep.mubr.bf16.mxu1 %v2051_v6 }
 0x32d   : > { %v1433_v53 = vpack.c.bf16 %v1427_v19, %v1425_v16  ;;  %v1396_v24 = vpop.permute.xlu0 %1395  ;;  %v1434_v30 = vpack.c.bf16 %v1428_v20, %v1426_v12 }
 0x32f   : > { %v1402_v51 = vpop.permute.xlu1 %1401  ;;  %1598 = vmatprep.subr.bf16.mxu1 %v1434_v30 }
 0x330   : > { %v1407_v29 = vsel %vm760_vm7, %v1394_v21, %v1402_v51  ;;  %v1411_v37 = vsel %vm760_vm7, %v1402_v51, %v1394_v21  ;;  %1599 = vmatpush1.bf16.msra.mxu1 %v1433_v53 }
 0x331   : > { %v1404_v34 = vpop.permute.xlu0 %1403  ;;  %v1429_v33 = vmul.f32 %v1418_v10, %v1407_v29  ;;  %v1430_v39 = vmul.f32 %v1422_v14, %v1411_v37 }
 0x332   : > { %v1408_v52 = vsel %vm760_vm7, %v1396_v24, %v1404_v34  ;;  %v1412_v59 = vsel %vm760_vm7, %v1404_v34, %v1396_v24  ;;  %v1692_v34 = vld [vmem:[%s3314_s7 + $0x8] sm:$0xff] }
 0x333   : > { %v1431_v22 = vmul.f32 %v1418_v10, %v1408_v52  ;;  %v1432_v57 = vmul.f32 %v1422_v14, %v1412_v59  ;;  %1588 = vmatmul.mubr.bf16.gmra.mrb[4].mxu1 %v2053_v27  ;;  %v1670_v14 = vld [vmem:[%s3313_s6 + $0x10] sm:$0xff]  ;;  %v1691_v52 = vld [vmem:[%s3314_s7] sm:$0xff] }
 0x334   : > { %1630 = vmatprep.mubr.bf16.mxu1 %v2243_v23 }
 0x335   : > { %v1435_v40 = vpack.c.bf16 %v1431_v22, %v1429_v33  ;;  %v1436_v41 = vpack.c.bf16 %v1432_v57, %v1430_v39  ;;  %v1694_v33 = vld [vmem:[%s3314_s7 + $0x18] sm:$0xff]  ;;  %v1693_v39 = vld [vmem:[%s3314_s7 + $0x10] sm:$0xff] }
 0x337   : > { %1600 = vmatprep.subr.bf16.mxu1 %v1436_v41 }
 0x338   : > { %1601 = vmatpush1.bf16.msra.mxu1 %v1435_v40 }
 0x33b   : > { %1909 = vmatmul.mubr.msk.bf16.vlgmr.msra.gmra.mrb[0].mxu1 %vm896_vm8, %v2054_v63 }
 0x33c   : > { %1640 = vmatprep.mubr.bf16.mxu1 %v2243_v23 }
 0x340   : > { %v1492_v11 = vpop.permute.xlu1 %1491 }
 0x342   : > { %v1497_v43 = vpop.permute.xlu0 %1496 }
 0x343   : > { %1910 = vmatmul.mubr.msk.bf16.gmra.mrb[4].mxu1 %vm896_vm8, %v2055_v15 }
 0x344   : > { %v1502_v58 = vpop.permute.xlu1 %1501 }
 0x346   : > { %v1507_v9 = vpop.permute.xlu0 %1506 }
 0x40e   : > { %v1632_v42 = vpop.f32.mrb[0].mxu1 }
 0x40f   : > { %v3180_v28 = vadd.f32 %v1632_v42, %v1492_v11  ;;  %v1634_v50 = vpop.f32.mrb[1].mxu1 }
 0x410   : > { %v3182_v44 = vadd.f32 %v1634_v50, %v1492_v11  ;;  %v1636_v45 = vpop.f32.mrb[2].mxu1 }
 0x411   : > { %v3184_v26 = vadd.f32 %v1636_v45, %v1497_v43  ;;  %v1638_v3 = vpop.f32.mrb[3].mxu1 }
 0x412   : > { %v1651_v46 = vadd.f32 %v3182_v44, %v3180_v28  ;;  %v3188_v47 = vadd.f32 %v1638_v3, %v1497_v43 }
 0x414   : > { %v1654_v23 = vadd.f32 %v3188_v47, %v3184_v26  ;;  %1652 = vadd.xlane.f32.xlu1 %v1651_v46 }
 0x416   : > { %v1642_v48 = vpop.f32.mrb[4].mxu1  ;;  %1655 = vadd.xlane.f32.xlu0 %v1654_v23 }
 0x417   : > { %v3192_v54 = vadd.f32 %v1642_v48, %v1502_v58  ;;  %v1644_v8 = vpop.f32.mrb[5].mxu1 }
 0x418   : > { %v3194_v4 = vadd.f32 %v1644_v8, %v1502_v58  ;;  %v1646_v25 = vpop.f32.mrb[6].mxu1 }
 0x419   : > { %v3196_v0 = vadd.f32 %v1646_v25, %v1507_v9  ;;  %v1648_v1 = vpop.f32.mrb[7].mxu1 }
 0x41a   : > { %v1657_v2 = vadd.f32 %v3194_v4, %v3192_v54  ;;  %v3200_v36 = vadd.f32 %v1648_v1, %v1507_v9 }
 0x41c   : > { %v1660_v60 = vadd.f32 %v3200_v36, %v3196_v0  ;;  %1658 = vadd.xlane.f32.xlu0 %v1657_v2 }
 0x41e   : > { %1661 = vadd.xlane.f32.xlu1 %v1660_v60 }
 0x4a1   : > { %v1653_v61 = vpop.xlane.xlu1 %1652 }
 0x4a2   : > { %v1664_v55 = vmul.f32 0.00390625, %v1653_v61 }
 0x4a3   : > { %v1656_v7 = vpop.xlane.xlu0 %1655 }
 0x4a4   : > { %v1665_v17 = vmul.f32 0.00390625, %v1656_v7  ;;  %v1672_v10 = vmul.f32 %v1668_v18, %v1664_v55  ;;  %v1745_v55 = vld [vmem:[%s2440_s11 + $0x10] sm:$0xff] }
 0x4a6   : > { %v1673_v49 = vmul.f32 %v1669_v38, %v1665_v17  ;;  %v1677_v5 = vsel %vm1676_vm9, %v1672_v10, 0.0  ;;  %v1746_v17 = vld [vmem:[%s2440_s11 + $0x18] sm:$0xff] }
 0x4a8   : > { %v1678_v62 = vsel %vm1676_vm9, %v1673_v49, 0.0 }
 0x4a9   : > { %v1659_v32 = vpop.xlane.xlu0 %1658  ;;  %v1679_v16 = vadd.f32 %v1678_v62, %v1677_v5 }
 0x4aa   : > { %v1666_v56 = vmul.f32 0.00390625, %v1659_v32  ;;  %v1744_v32 = vld [vmem:[%s2440_s11 + $0x8] sm:$0xff] }
 0x4ab   : > { %v1662_v6 = vpop.xlane.xlu1 %1661 }
 0x4ac   : > { %v1674_v31 = vmul.f32 %v1670_v14, %v1666_v56  ;;  %v1667_v13 = vmul.f32 0.00390625, %v1662_v6  ;;  %v1743_v14 = vld [vmem:[%s2440_s11] sm:$0xff] }
 0x4ae   : > { %v1680_v12 = vsel %vm1676_vm9, %v1674_v31, 0.0  ;;  %v1675_v19 = vmul.f32 %v1671_v35, %v1667_v13 }
 0x4af   : > { %v1681_v20 = vadd.f32 %v1680_v12, %v1679_v16  ;;  %v1749_v16 = vld [vmem:[%s2440_s11 + $0x30] sm:$0xff]  ;;  %v1750_v12 = vld [vmem:[%s2440_s11 + $0x38] sm:$0xff] }
 0x4b0   : > { %v1682_v21 = vsel %vm1676_vm9, %v1675_v19, 0.0 }
 0x4b1   : > { %v1683_v53 = vadd.f32 %v1682_v21, %v1681_v20 }
 0x4b3   : > { %v1684_v24 = vrot.slane %v1683_v53, 4 }
 0x4b5   : > { %v1685_v30 = vadd.f32 %v1684_v24, %v1683_v53  ;;  %v1747_v53 = vld [vmem:[%s2440_s11 + $0x20] sm:$0xff]  ;;  %v1748_v24 = vld [vmem:[%s2440_s11 + $0x28] sm:$0xff] }
 0x4b7   : > { %v1686_v51 = vrot.slane %v1685_v30, 2 }
 0x4b9   : > { %v1687_v27 = vadd.f32 %v1686_v51, %v1685_v30 }
 0x4bb   : > { %v1688_v29 = vrot.slane %v1687_v27, 1 }
 0x4bd   : > { %v1689_v37 = vadd.f32 %v1688_v29, %v1687_v27 }
 0x4bf   : > { %v1690_v59 = vmax.f32 %v1689_v37, 0.0 }
 0x4c1   : > { %v1696_v22 = vmul.f32 %v1692_v34, %v1690_v59  ;;  %v1695_v57 = vmul.f32 %v1691_v52, %v1690_v59  ;;  %v1698_v63 = vmul.f32 %v1694_v33, %v1690_v59  ;;  %v1697_v15 = vmul.f32 %v1693_v39, %v1690_v59 }
 0x4c3   : > { %v1702_v40 = vsel %vm1676_vm9, %v1696_v22, 0.0  ;;  %v1699_v41 = vsel %vm1676_vm9, %v1695_v57, 0.0  ;;  %v1708_v11 = vsel %vm1676_vm9, %v1698_v63, 0.0  ;;  %v1705_v42 = vsel %vm1676_vm9, %v1697_v15, 0.0 }
 0x4c4   : > { %1703 = vadd.xlane.f32.xlu1 %v1702_v40  ;;  %1700 = vadd.xlane.f32.xlu0 %v1699_v41 }
 0x4c8   : > { %1709 = vadd.xlane.f32.xlu1 %v1708_v11  ;;  %1706 = vadd.xlane.f32.xlu0 %v1705_v42 }
 0x551   : > { %v1704_v50 = vpop.xlane.xlu1 %1703  ;;  %v1701_v43 = vpop.xlane.xlu0 %1700 }
 0x552   : > { %v1912_v45 = vmul.f32 -1.442695, %v1704_v50  ;;  %v1911_v3 = vmul.f32 -1.442695, %v1701_v43 }
 0x554   : > { %2056 = vpow2.f32 %v1912_v45 }
 0x555   : > { %2058 = vpow2.f32 %v1911_v3  ;;  %v1710_v46 = vpop.xlane.xlu1 %1709  ;;  %v1707_v23 = vpop.xlane.xlu0 %1706 }
 0x556   : > { %v1914_v58 = vmul.f32 -1.442695, %v1710_v46  ;;  %v1913_v48 = vmul.f32 -1.442695, %v1707_v23 }
 0x558   : > { %2060 = vpow2.f32 %v1914_v58 }
 0x559   : > { %2062 = vpow2.f32 %v1913_v48 }
 0x55e   : > { %v2057_v8 = vpop.eup %2056 }
 0x55f   : > { %v2059_v9 = vpop.eup %2058  ;;  %v1724_v25 = vadd.f32 1.0, %v2057_v8 }
 0x560   : > { %v1723_v1 = vadd.f32 1.0, %v2059_v9 }
 0x561   : > { %2064 = vrcp.f32 %v1724_v25 }
 0x562   : > { %v2061_v2 = vpop.eup %2060  ;;  %2066 = vrcp.f32 %v1723_v1 }
 0x563   : > { %v2063_v60 = vpop.eup %2062  ;;  %v1726_v61 = vadd.f32 1.0, %v2061_v2 }
 0x564   : > { %v1725_v38 = vadd.f32 1.0, %v2063_v60 }
 0x565   : > { %2068 = vrcp.f32 %v1726_v61 }
 0x566   : > { %2070 = vrcp.f32 %v1725_v38 }
 0x56b   : > { %v2065_v7 = vpop.eup %2064 }
 0x56c   : > { %v2067_v18 = vpop.eup %2066  ;;  %v1737_v49 = vmul.f32 %v2065_v7, %v3184_v26  ;;  %v1738_v10 = vmul.f32 %v2065_v7, %v3188_v47 }
 0x56d   : > { %v1735_v62 = vmul.f32 %v2067_v18, %v3180_v28  ;;  %v1736_v56 = vmul.f32 %v2067_v18, %v3182_v44 }
 0x56e   : > { %v1753_v35 = vadd.f32 %v1745_v55, %v1737_v49  ;;  %v1754_v6 = vadd.f32 %v1746_v17, %v1738_v10 }
 0x56f   : > { %v2069_v5 = vpop.eup %2068  ;;  %v1751_v31 = vadd.f32 %v1743_v14, %v1735_v62  ;;  %v1752_v13 = vadd.f32 %v1744_v32, %v1736_v56 }
 0x570   : > { %v2071_v19 = vpop.eup %2070  ;;  %v1761_v26 = vmax.f32 %v1753_v35, 0.0  ;;  %v1762_v20 = vmax.f32 %v1754_v6, 0.0  ;;  %v1741_v47 = vmul.f32 %v2069_v5, %v3196_v0  ;;  %v1742_v21 = vmul.f32 %v2069_v5, %v3200_v36 }
 0x571   : > { %v1759_v28 = vmax.f32 %v1751_v31, 0.0  ;;  %v1760_v30 = vmax.f32 %v1752_v13, 0.0  ;;  %v1739_v44 = vmul.f32 %v2071_v19, %v3192_v54  ;;  %v1740_v51 = vmul.f32 %v2071_v19, %v3194_v4 }
 0x572   : > { %1769 = vst [vmem:[%s342_s12 + $0x10] sm:$0xff] %v1761_v26  ;;  %1770 = vst [vmem:[%s342_s12 + $0x18] sm:$0xff] %v1762_v20  ;;  %v1757_v27 = vadd.f32 %v1749_v16, %v1741_v47  ;;  %v1758_v29 = vadd.f32 %v1750_v12, %v1742_v21 }
 0x573   : > { %1767 = vst [vmem:[%s342_s12] sm:$0xff] %v1759_v28  ;;  %1768 = vst [vmem:[%s342_s12 + $0x8] sm:$0xff] %v1760_v30  ;;  %v1755_v0 = vadd.f32 %v1747_v53, %v1739_v44  ;;  %v1756_v36 = vadd.f32 %v1748_v24, %v1740_v51 }
 0x574   : > { %v1765_v37 = vmax.f32 %v1757_v27, 0.0  ;;  %v1766_v34 = vmax.f32 %v1758_v29, 0.0 }
 0x575   : > { %v1763_v54 = vmax.f32 %v1755_v0, 0.0  ;;  %v1764_v4 = vmax.f32 %v1756_v36, 0.0 }
 0x576   : > { %1773 = vst [vmem:[%s342_s12 + $0x30] sm:$0xff] %v1765_v37  ;;  %1774 = vst [vmem:[%s342_s12 + $0x38] sm:$0xff] %v1766_v34 }
 0x577   : > { %1771 = vst [vmem:[%s342_s12 + $0x20] sm:$0xff] %v1763_v54  ;;  %1772 = vst [vmem:[%s342_s12 + $0x28] sm:$0xff] %v1764_v4 }
 0x578   : > { %2169 = shalt.err (!%p2166_p11)
}
 0x579   : > { %s2170_s19 = scalar_lea.hbm %s3259_s25, 1024  ;;  %s2174_s22 = scalar_lea.hbm %s3315_s8, 2048 }
 0x57a   : > { %p2171_p5 = scmp.ne.s32.totalorder %s3259_s25, %s2170_s19  ;;  %p2175_p9 = scmp.lt.u32.totalorder %s3259_s25, %s3315_s8 }
 0x57b   : > { %p2176_p10 = scmp.lt.u32.totalorder %s2174_s22, %s2170_s19  ;;  %p2178_p12 = scmp.lt.u32.totalorder %s2170_s19, %s3259_s25 }
 0x57c   : > { %p2172_p0 = pnand %p2171_p5, %p3341_p1 }
 0x57d   : > { %p2177_p13 = por %p2176_p10, %p2175_p9 }
 0x57e   : > { %p2173_p6 = pneg %p2172_p0 }
 0x57f   : > { %p2179_p2 = por %p2178_p12, %p2177_p13 }
 0x581   : > { %p2180_p3 = pnand %p2179_p2, %p2173_p6 }
 0x583   : > { %2183 = shalt.err (!%p2180_p3)
}
 0x584   : > { %s2245_s20 = smov 256  }
 0x585   : > { %1966 = dma.vmem_to_hbm [thread:$0]  (%p3341_p1), %s3261_s29, 1024, %s3259_s25, %s3265_s9, %s2245_s20, %s2245_s20, %s2236_s26  }
 0x586 PF: > { %p1988_p4 = scmp.ge.s32.totalorder %s2226_s30, 2  ;;  %s1804_s12 = sand.u32 1, %s2214_s27  }
 0x587   : > { %p3342_p7 = scmp.ne.s32.totalorder %s3329_s16, 0  ;;  %s1805_s11 = scalar_lea.sflag [#allocation5], %s1804_s12 }
 0x589   : > { %p1979_p8 = pnand %p1988_p4, %p3342_p7 }
 0x58b   : > { %2209 = dma.done.wait (!%p1979_p8), %s1805_s11, 1024  }
 0x58c   : > { %2211 = vsyncadd (!%p1979_p8), %s1805_s11, 4294966272  ;;  %s3343_s30 = sld [smem:[#allocation14_spill]]  ;;  %s3344_s17 = sld [smem:[#allocation13_spill]] }
 0x58d   : > { %s3345_s29 = sld [smem:[#allocation15_spill]]  ;;  %s3346_s27 = smov %s2218_s28 }
 0x592   : > { %p20_p11 = scmp.ge.s32.totalorder %s3343_s30, 4   ;;  %s3347_s28 = smov %s3344_s17 }
 0x594   :  { %22 = sbr.rel (!%p20_p11) target bundleno = 7 (0x7), region = 107 }
 0x59b   :  { %1810 = vsyncpa [#allocation4], 1 }
 0x59c   :  { %1812 = vsyncpa [#allocation4 + $0x1], 1 }
 0x59d   :  { %1813 = vsyncpa [#allocation7], 1 }
 0x59e   :  { %1814 = vsyncpa [#allocation5], 1 }
 0x59f   :  { %1816 = vsyncpa [#allocation5 + $0x1], 1 }

</bundles_post_ra>
